<compile_context>
chip_gen: v6e
topology: v6e:2x2x1
jax: 0.10.0
libtpu: 0.0.40
codegen_flags: <defaults>
</compile_context>

<pallas_src>
import functools

import jax
import jax.numpy as jnp
from jax import lax
from jax.experimental import pallas as pl
from jax.experimental.pallas import tpu as pltpu

POS_WEIGHT = 30.0   # module's self.pos_weight
_NEG_LARGE = -1e30  # finite "-inf" for masked lanes (avoids inf arithmetic)


def _loss_kernel(logits_ref, aux_ref, tgt_ref, partial_ref,
                 acc_bce, acc_ce, acc_cnt, *, t_actual, half, pos_weight):
    """Grid = (2, half): axis 0 is a 2-way 'parallel' core split, axis 1 walks
    this core's row blocks ('arbitrary'); partials live in VMEM scratch."""
    c = pl.program_id(0)
    i = pl.program_id(1)
    n_i = pl.num_programs(1)

    tile, c_full = logits_ref.shape

    @pl.when(i == 0)
    def _init():
        acc_bce[...] = jnp.zeros_like(acc_bce)
        acc_ce[...] = jnp.zeros_like(acc_ce)
        acc_cnt[...] = jnp.zeros_like(acc_cnt)

    # Logical (unclamped) block index -> first row covered by this step.  The
    # DMA index_map clamps to the last real block; rows >= t_actual (ragged edge
    # or fully out-of-range blocks) are masked below with jnp.where so garbage
    # data never reaches the sums (not even as 0 * NaN).
    row0 = (c * half + i) * tile

    blk = logits_ref[...].astype(jnp.float32)   # [tile, C]  (lane 0 = onset logit)
    aux = aux_ref[...].astype(jnp.float32)      # [2, tile]  (onset logit, onset target)
    tgt = tgt_ref[...].astype(jnp.float32)      # [tile, 2]  (onset target, class id)

    # ---- onset BCE-with-logits, lane-dense [1, tile] layout ------------------
    x = aux[0:1, :]                                             # [1, tile]
    y = aux[1:2, :]                                             # [1, tile]
    col = lax.broadcasted_iota(jnp.int32, (1, tile), 1) + row0
    valid_lane = col < t_actual                                 # [1, tile] bool
    weight = jnp.where(y != 0.0, pos_weight, 1.0)               # [1, tile]
    bce = jnp.maximum(x, 0.0) - x * y + jnp.log(1.0 + jnp.exp(-jnp.abs(x)))
    acc_bce[...] += jnp.where(valid_lane, weight * bce, 0.0)

    # ---- symbol cross-entropy over lanes 1..C-1 (lane 0 masked out) ----------
    lane = lax.broadcasted_iota(jnp.int32, (tile, c_full), 1)   # [tile, C]
    z = jnp.where(lane >= 1, blk, _NEG_LARGE)
    m = jnp.max(z, axis=-1, keepdims=True)                      # XLU   [tile, 1]
    e = jnp.exp(z - m)                                          # EUP   [tile, C]
    ones_c = jnp.ones((c_full, 1), jnp.float32)
    denom = jnp.dot(e, ones_c, preferred_element_type=jnp.float32)       # MXU [tile,1]
    cls = tgt[:, 1:2].astype(jnp.int32) + 1                     # symbol c -> lane c+1
    picked = jnp.dot(jnp.where(lane == cls, blk, 0.0), ones_c,
                     preferred_element_type=jnp.float32)                 # MXU [tile,1]
    ce = jnp.log(denom) + m - picked                            # [tile, 1] per-frame NLL

    row = lax.broadcasted_iota(jnp.int32, (tile, 1), 0) + row0
    onset_row = jnp.logical_and(tgt[:, 0:1] != 0.0, row < t_actual)      # [tile, 1]
    acc_ce[...] += jnp.where(onset_row, ce, 0.0)
    acc_cnt[...] += jnp.where(onset_row, 1.0, 0.0)

    # ---- per-core finalize: one tree-reduction per accumulator, once ---------
    @pl.when(i == n_i - 1)
    def _finalize():
        bce_sum = jnp.sum(acc_bce[...])
        ce_sum = jnp.sum(acc_ce[...])
        cnt_sum = jnp.sum(acc_cnt[...])
        slot = lax.broadcasted_iota(jnp.int32, (1, 1, 3), 2)
        partial_ref[...] = jnp.where(slot == 0, bce_sum,
                                     jnp.where(slot == 1, ce_sum, cnt_sum))


def loss_for_oneshot(outputs, targets, out_channels=257, tile_t=1024):
    """outputs: [1, T, out_channels] (onset logit + (out_channels-1) symbol logits)
       targets: [1, T, 2]            (onset target, symbol class id in 0..out_channels-2)"""
    assert outputs.ndim == 3 and outputs.shape[0] == 1
    assert targets.ndim == 3 and targets.shape[0] == 1
    assert outputs.shape[2] == out_channels
    T = outputs.shape[1]
    c_full = outputs.shape[2]
    c_tgt = targets.shape[2]

    logits = outputs[0]                      # [T, C] native dtype, no pad / no copy
    tgt2d = targets[0]                       # [T, 2]
    # Tiny lane-dense aux (~16*T bytes of HBM): onset logit + onset target as rows.
    aux = jnp.stack([outputs[0, :, 0].astype(jnp.float32),
                     targets[0, :, 0].astype(jnp.float32)], axis=0)      # [2, T]

    if T <= tile_t:
        tile = T                             # single block: block dims == full dims
    else:
        assert tile_t % 128 == 0, "tile_t must be a multiple of 128"
        tile = tile_t
    n_blocks = (T + tile - 1) // tile        # no padding of the inputs
    half = (n_blocks + 1) // 2               # row blocks per core (2-way split)

    def blk_idx(c, i):                       # clamp the DMA target to a real block;
        return jnp.minimum(c * half + i, n_blocks - 1)   # validity is masked in-kernel

    kernel = functools.partial(_loss_kernel, t_actual=T, half=half,
                               pos_weight=POS_WEIGHT)
    partials = pl.pallas_call(
        kernel,
        out_shape=jax.ShapeDtypeStruct((2, 1, 3), jnp.float32),
        grid=(2, half),
        in_specs=[
            pl.BlockSpec((tile, c_full), lambda c, i: (blk_idx(c, i), 0)),
            pl.BlockSpec((2, tile), lambda c, i: (0, blk_idx(c, i))),
            pl.BlockSpec((tile, c_tgt), lambda c, i: (blk_idx(c, i), 0)),
        ],
        out_specs=pl.BlockSpec((1, 1, 3), lambda c, i: (c, 0, 0)),
        scratch_shapes=[
            pltpu.VMEM((1, tile), jnp.float32),   # per-lane  sum(w * bce)
            pltpu.VMEM((tile, 1), jnp.float32),   # per-row   sum(mask * ce)
            pltpu.VMEM((tile, 1), jnp.float32),   # per-row   sum(mask)   (onset count)
        ],
        compiler_params=pltpu.CompilerParams(
            dimension_semantics=("parallel", "arbitrary")),
    )(logits, aux, tgt2d)

    p = partials.reshape(2, 3).sum(axis=0)        # combine the two cores' partials
    onset_loss = p[0] / jnp.float32(T)
    symbol_loss = p[1] / jnp.maximum(p[2], 1.0)   # exactly 0.0 when no onset frames
    return onset_loss + symbol_loss


def _reference(outputs, targets):
    """Pure-JAX reference mirroring the PyTorch forward."""
    x = outputs[0, :, 0].astype(jnp.float32)
    y = targets[0, :, 0].astype(jnp.float32)
    sym_out = outputs[0, :, 1:].astype(jnp.float32)
    sym_tgt = targets[0, :, 1].astype(jnp.int32)
    mask = (y != 0.0).astype(jnp.float32)
    w = jnp.where(mask > 0, POS_WEIGHT, 1.0)
    bce = jnp.maximum(x, 0.0) - x * y + jnp.log(1.0 + jnp.exp(-jnp.abs(x)))
    onset_loss = jnp.mean(w * bce)
    lse = jax.nn.logsumexp(sym_out, axis=-1)
    ce = lse - jnp.take_along_axis(sym_out, sym_tgt[:, None], axis=-1)[:, 0]
    symbol_loss = jnp.sum(mask * ce) / jnp.maximum(jnp.sum(mask), 1.0)
    return onset_loss + symbol_loss


if __name__ == "__main__":
    key = jax.random.PRNGKey(0)
    T = 500                       # not a multiple of any tile -> exercises ragged masking
    OUT_CHANNELS = 257            # 1 onset logit + 256 symbol logits (class ids 0..255)

    k1, k2, k3 = jax.random.split(key, 3)
    outputs = jax.random.normal(k1, (1, T, OUT_CHANNELS), dtype=jnp.float32)
    onset_t = (jax.random.uniform(k2, (1, T, 1)) < 0.3).astype(jnp.float32)
    sym_t = jax.random.randint(k3, (1, T, 1), 0, OUT_CHANNELS - 1).astype(jnp.float32)
    targets = jnp.concatenate([onset_t, sym_t], axis=-1)   # [1, T, 2]

    ref = _reference(outputs, targets)

    # Multi-block path: ragged last block + 2-way core split over 4 blocks.
    loss_tiled = loss_for_oneshot(outputs, targets, OUT_CHANNELS, tile_t=128)
    jax.block_until_ready(loss_tiled)
    assert jnp.allclose(loss_tiled, ref, atol=1e-4, rtol=1e-4), (loss_tiled, ref)

    # Default path: single block (tile == T), no alignment requirements.
    loss_default = loss_for_oneshot(outputs, targets, OUT_CHANNELS)
    jax.block_until_ready(loss_default)
    assert jnp.allclose(loss_default, ref, atol=1e-4, rtol=1e-4), (loss_default, ref)

    # No-onset corner case: symbol_loss must be exactly 0 (torch else-branch).
    targets_no_onset = jnp.concatenate([jnp.zeros_like(onset_t), sym_t], axis=-1)
    loss_no_onset = loss_for_oneshot(outputs, targets_no_onset, OUT_CHANNELS, tile_t=128)
    jax.block_until_ready(loss_no_onset)
    ref_no_onset = _reference(outputs, targets_no_onset)
    assert jnp.allclose(loss_no_onset, ref_no_onset, atol=1e-4, rtol=1e-4), (
        loss_no_onset, ref_no_onset)

    print("KERNEL_OK")
</pallas_src>

<mosaic_0001>
module attributes {stable_mosaic.version = 11 : i64} {
  func.func @_loss_kernel(%arg0: i32, %arg1: i32, %arg2: memref<128x257xf32, #tpu.memory_space<vmem>>, %arg3: memref<2x128xf32, #tpu.memory_space<vmem>>, %arg4: memref<128x2xf32, #tpu.memory_space<vmem>>, %arg5: memref<1x1x3xf32, #tpu.memory_space<vmem>>, %arg6: memref<1x128xf32, #tpu.memory_space<vmem>>, %arg7: memref<128x1xf32, #tpu.memory_space<vmem>>, %arg8: memref<128x1xf32, #tpu.memory_space<vmem>>) attributes {dimension_semantics = [#tpu.dimension_semantics<parallel>, #tpu.dimension_semantics<arbitrary>], iteration_bounds = array<i64: 2, 2>, scalar_prefetch = 0 : i64, scratch_operands = 3 : i64, tpu.core_type = #tpu.core_type<tc>, window_params = [{transform_indices = @transform_0, window_bounds = array<i64: 128, 257>}, {transform_indices = @transform_1, window_bounds = array<i64: 2, 128>}, {transform_indices = @transform_2, window_bounds = array<i64: 128, 2>}, {transform_indices = @transform_3, window_bounds = array<i64: 1, 1, 3>}]} {
    %c0_i32 = arith.constant 0 : i32
    %0 = arith.cmpi eq, %arg1, %c0_i32 : i32
    %1 = arith.extui %0 : i1 to i32
    %c0_i32_0 = arith.constant 0 : i32
    %2 = arith.cmpi ne, %1, %c0_i32_0 : i32
    scf.if %2 {
      %cst_38 = arith.constant 0.000000e+00 : f32
      %86 = vector.broadcast %cst_38 : f32 to vector<1x128xf32>
      %c0_39 = arith.constant 0 : index
      %c0_40 = arith.constant 0 : index
      %87 = vector.load %arg6[%c0_39, %c0_40] : memref<1x128xf32, #tpu.memory_space<vmem>>, vector<1x128xf32>
      tpu.vector_store %arg6[%c0_39, %c0_40], %86 {strides = array<i32>} : memref<1x128xf32, #tpu.memory_space<vmem>>, vector<1x128xf32>,
      %cst_41 = arith.constant 0.000000e+00 : f32
      %88 = vector.broadcast %cst_41 : f32 to vector<128x1xf32>
      %c0_42 = arith.constant 0 : index
      %c0_43 = arith.constant 0 : index
      %89 = vector.load %arg7[%c0_42, %c0_43] : memref<128x1xf32, #tpu.memory_space<vmem>>, vector<128x1xf32>
      tpu.vector_store %arg7[%c0_42, %c0_43], %88 {strides = array<i32>} : memref<128x1xf32, #tpu.memory_space<vmem>>, vector<128x1xf32>,
      %cst_44 = arith.constant 0.000000e+00 : f32
      %90 = vector.broadcast %cst_44 : f32 to vector<128x1xf32>
      %c0_45 = arith.constant 0 : index
      %c0_46 = arith.constant 0 : index
      %91 = vector.load %arg8[%c0_45, %c0_46] : memref<128x1xf32, #tpu.memory_space<vmem>>, vector<128x1xf32>
      tpu.vector_store %arg8[%c0_45, %c0_46], %90 {strides = array<i32>} : memref<128x1xf32, #tpu.memory_space<vmem>>, vector<128x1xf32>,
    } else {
    }
    %c2_i32 = arith.constant 2 : i32
    %3 = arith.muli %arg0, %c2_i32 : i32
    %4 = arith.addi %3, %arg1 : i32
    %c128_i32 = arith.constant 128 : i32
    %5 = arith.muli %4, %c128_i32 : i32
    %c0 = arith.constant 0 : index
    %c0_1 = arith.constant 0 : index
    %6 = vector.load %arg2[%c0, %c0_1] : memref<128x257xf32, #tpu.memory_space<vmem>>, vector<128x257xf32>
    %c0_2 = arith.constant 0 : index
    %c0_3 = arith.constant 0 : index
    %7 = vector.load %arg3[%c0_2, %c0_3] : memref<2x128xf32, #tpu.memory_space<vmem>>, vector<2x128xf32>
    %c0_4 = arith.constant 0 : index
    %c0_5 = arith.constant 0 : index
    %8 = vector.load %arg4[%c0_4, %c0_5] : memref<128x2xf32, #tpu.memory_space<vmem>>, vector<128x2xf32>
    %9 = vector.extract_strided_slice %7 {offsets = [0, 0], sizes = [1, 128], strides = [1, 1]} : vector<2x128xf32> to vector<1x128xf32>
    %10 = vector.extract_strided_slice %7 {offsets = [1, 0], sizes = [1, 128], strides = [1, 1]} : vector<2x128xf32> to vector<1x128xf32>
    %11 = tpu.iota {dimensions = array<i32: 1>} : vector<1x128xi32>
    %12 = vector.broadcast %5 : i32 to vector<1x128xi32>
    %13 = arith.addi %11, %12 : vector<1x128xi32>
    %c500_i32 = arith.constant 500 : i32
    %14 = vector.broadcast %c500_i32 : i32 to vector<1x128xi32>
    %15 = arith.cmpi slt, %13, %14 : vector<1x128xi32>
    %cst = arith.constant 0.000000e+00 : f32
    %16 = vector.broadcast %cst : f32 to vector<1x128xf32>
    %17 = arith.cmpf one, %10, %16 : vector<1x128xf32>
    %cst_6 = arith.constant 3.000000e+01 : f32
    %cst_7 = arith.constant 1.000000e+00 : f32
    %18 = vector.broadcast %cst_6 : f32 to vector<1x128xf32>
    %19 = vector.broadcast %cst_7 : f32 to vector<1x128xf32>
    %20 = arith.select %17, %18, %19 : vector<1x128xi1>, vector<1x128xf32>
    %cst_8 = arith.constant 0.000000e+00 : f32
    %21 = vector.broadcast %cst_8 : f32 to vector<1x128xf32>
    %22 = arith.maximumf %9, %21 : vector<1x128xf32>
    %23 = arith.mulf %9, %10 : vector<1x128xf32>
    %24 = arith.subf %22, %23 : vector<1x128xf32>
    %25 = math.absf %9 : vector<1x128xf32>
    %cst_9 = arith.constant 0.000000e+00 : f32
    %26 = vector.broadcast %cst_9 : f32 to vector<1x128xf32>
    %27 = arith.subf %26, %25 : vector<1x128xf32>
    %28 = math.exp %27 : vector<1x128xf32>
    %cst_10 = arith.constant 1.000000e+00 : f32
    %29 = vector.broadcast %cst_10 : f32 to vector<1x128xf32>
    %30 = arith.addf %29, %28 : vector<1x128xf32>
    %31 = math.log %30 : vector<1x128xf32>
    %32 = arith.addf %24, %31 : vector<1x128xf32>
    %c0_11 = arith.constant 0 : index
    %c0_12 = arith.constant 0 : index
    %33 = vector.load %arg6[%c0_11, %c0_12] : memref<1x128xf32, #tpu.memory_space<vmem>>, vector<1x128xf32>
    %34 = arith.mulf %20, %32 : vector<1x128xf32>
    %cst_13 = arith.constant 0.000000e+00 : f32
    %35 = vector.broadcast %cst_13 : f32 to vector<1x128xf32>
    %36 = arith.select %15, %34, %35 : vector<1x128xi1>, vector<1x128xf32>
    %37 = arith.addf %33, %36 : vector<1x128xf32>
    %c0_14 = arith.constant 0 : index
    %c0_15 = arith.constant 0 : index
    %38 = vector.load %arg6[%c0_14, %c0_15] : memref<1x128xf32, #tpu.memory_space<vmem>>, vector<1x128xf32>
    tpu.vector_store %arg6[%c0_14, %c0_15], %37 {strides = array<i32>} : memref<1x128xf32, #tpu.memory_space<vmem>>, vector<1x128xf32>,
    %39 = tpu.iota {dimensions = array<i32: 1>} : vector<128x257xi32>
    %c1_i32 = arith.constant 1 : i32
    %40 = vector.broadcast %c1_i32 : i32 to vector<128x257xi32>
    %41 = arith.cmpi sge, %39, %40 : vector<128x257xi32>
    %cst_16 = arith.constant -1.000000e+30 : f32
    %42 = vector.broadcast %cst_16 : f32 to vector<128x257xf32>
    %43 = arith.select %41, %6, %42 : vector<128x257xi1>, vector<128x257xf32>
    %cst_17 = arith.constant dense<0xFF800000> : vector<128xf32>
    %44 = vector.multi_reduction <maximumf>, %43, %cst_17 [1] : vector<128x257xf32> to vector<128xf32>
    %45 = vector.shape_cast %44 : vector<128xf32> to vector<128x1xf32>
    %46 = vector.broadcast %45 : vector<128x1xf32> to vector<128x257xf32>
    %47 = arith.subf %43, %46 : vector<128x257xf32>
    %48 = math.exp %47 : vector<128x257xf32>
    %cst_18 = arith.constant 1.000000e+00 : f32
    %49 = vector.broadcast %cst_18 : f32 to vector<257x1xf32>
    %cst_19 = arith.constant dense<0.000000e+00> : vector<128x1xf32>
    %50 = tpu.matmul %48, %49, %cst_19 {dimension_numbers = #tpu.dot_dimension_numbers<[1], [0], [0], [1], [0, 0, 1, 1], [], []>} : vector<128x257xf32>, vector<257x1xf32>, vector<128x1xf32> -> vector<128x1xf32>
    %51 = vector.extract_strided_slice %8 {offsets = [0, 1], sizes = [128, 1], strides = [1, 1]} : vector<128x2xf32> to vector<128x1xf32>
    %52 = arith.fptosi %51 : vector<128x1xf32> to vector<128x1xi32>
    %c1_i32_20 = arith.constant 1 : i32
    %53 = vector.broadcast %c1_i32_20 : i32 to vector<128x1xi32>
    %54 = arith.addi %52, %53 : vector<128x1xi32>
    %55 = vector.broadcast %54 : vector<128x1xi32> to vector<128x257xi32>
    %56 = arith.cmpi eq, %39, %55 : vector<128x257xi32>
    %cst_21 = arith.constant 0.000000e+00 : f32
    %57 = vector.broadcast %cst_21 : f32 to vector<128x257xf32>
    %58 = arith.select %56, %6, %57 : vector<128x257xi1>, vector<128x257xf32>
    %cst_22 = arith.constant dense<0.000000e+00> : vector<128x1xf32>
    %59 = tpu.matmul %58, %49, %cst_22 {dimension_numbers = #tpu.dot_dimension_numbers<[1], [0], [0], [1], [0, 0, 1, 1], [], []>} : vector<128x257xf32>, vector<257x1xf32>, vector<128x1xf32> -> vector<128x1xf32>
    %60 = math.log %50 : vector<128x1xf32>
    %61 = arith.addf %60, %45 : vector<128x1xf32>
    %62 = arith.subf %61, %59 : vector<128x1xf32>
    %63 = tpu.iota {dimensions = array<i32: 0>} : vector<128x1xi32>
    %64 = vector.broadcast %5 : i32 to vector<128x1xi32>
    %65 = arith.addi %63, %64 : vector<128x1xi32>
    %66 = vector.extract_strided_slice %8 {offsets = [0, 0], sizes = [128, 1], strides = [1, 1]} : vector<128x2xf32> to vector<128x1xf32>
    %cst_23 = arith.constant 0.000000e+00 : f32
    %67 = vector.broadcast %cst_23 : f32 to vector<128x1xf32>
    %68 = arith.cmpf one, %66, %67 : vector<128x1xf32>
    %c500_i32_24 = arith.constant 500 : i32
    %69 = vector.broadcast %c500_i32_24 : i32 to vector<128x1xi32>
    %70 = arith.cmpi slt, %65, %69 : vector<128x1xi32>
    %71 = arith.andi %68, %70 : vector<128x1xi1>
    %c0_25 = arith.constant 0 : index
    %c0_26 = arith.constant 0 : index
    %72 = vector.load %arg7[%c0_25, %c0_26] : memref<128x1xf32, #tpu.memory_space<vmem>>, vector<128x1xf32>
    %cst_27 = arith.constant 0.000000e+00 : f32
    %73 = vector.broadcast %cst_27 : f32 to vector<128x1xf32>
    %74 = arith.select %71, %62, %73 : vector<128x1xi1>, vector<128x1xf32>
    %75 = arith.addf %72, %74 : vector<128x1xf32>
    %c0_28 = arith.constant 0 : index
    %c0_29 = arith.constant 0 : index
    %76 = vector.load %arg7[%c0_28, %c0_29] : memref<128x1xf32, #tpu.memory_space<vmem>>, vector<128x1xf32>
    tpu.vector_store %arg7[%c0_28, %c0_29], %75 {strides = array<i32>} : memref<128x1xf32, #tpu.memory_space<vmem>>, vector<128x1xf32>,
    %c0_30 = arith.constant 0 : index
    %c0_31 = arith.constant 0 : index
    %77 = vector.load %arg8[%c0_30, %c0_31] : memref<128x1xf32, #tpu.memory_space<vmem>>, vector<128x1xf32>
    %cst_32 = arith.constant 1.000000e+00 : f32
    %cst_33 = arith.constant 0.000000e+00 : f32
    %78 = vector.broadcast %cst_32 : f32 to vector<128x1xf32>
    %79 = vector.broadcast %cst_33 : f32 to vector<128x1xf32>
    %80 = arith.select %71, %78, %79 : vector<128x1xi1>, vector<128x1xf32>
    %81 = arith.addf %77, %80 : vector<128x1xf32>
    %c0_34 = arith.constant 0 : index
    %c0_35 = arith.constant 0 : index
    %82 = vector.load %arg8[%c0_34, %c0_35] : memref<128x1xf32, #tpu.memory_space<vmem>>, vector<128x1xf32>
    tpu.vector_store %arg8[%c0_34, %c0_35], %81 {strides = array<i32>} : memref<128x1xf32, #tpu.memory_space<vmem>>, vector<128x1xf32>,
    %c1_i32_36 = arith.constant 1 : i32
    %83 = arith.cmpi eq, %arg1, %c1_i32_36 : i32
    %84 = arith.extui %83 : i1 to i32
    %c0_i32_37 = arith.constant 0 : i32
    %85 = arith.cmpi ne, %84, %c0_i32_37 : i32
    scf.if %85 {
      %c0_38 = arith.constant 0 : index
      %c0_39 = arith.constant 0 : index
      %86 = vector.load %arg6[%c0_38, %c0_39] : memref<1x128xf32, #tpu.memory_space<vmem>>, vector<1x128xf32>
      %87 = vector.shape_cast %86 : vector<1x128xf32> to vector<1x1x128xf32>
      %cst_40 = arith.constant dense<0.000000e+00> : vector<1xf32>
      %88 = vector.multi_reduction <add>, %87, %cst_40 [1, 2] : vector<1x1x128xf32> to vector<1xf32>
      %89 = vector.shape_cast %88 : vector<1xf32> to vector<1x1x1xf32>
      %90 = vector.extract %89[0, 0, 0] : f32 from vector<1x1x1xf32>
      %c0_41 = arith.constant 0 : index
      %c0_42 = arith.constant 0 : index
      %91 = vector.load %arg7[%c0_41, %c0_42] : memref<128x1xf32, #tpu.memory_space<vmem>>, vector<128x1xf32>
      %92 = vector.shape_cast %91 : vector<128x1xf32> to vector<1x128x1xf32>
      %cst_43 = arith.constant dense<0.000000e+00> : vector<1xf32>
      %93 = vector.multi_reduction <add>, %92, %cst_43 [1, 2] : vector<1x128x1xf32> to vector<1xf32>
      %94 = vector.shape_cast %93 : vector<1xf32> to vector<1x1x1xf32>
      %95 = vector.extract %94[0, 0, 0] : f32 from vector<1x1x1xf32>
      %c0_44 = arith.constant 0 : index
      %c0_45 = arith.constant 0 : index
      %96 = vector.load %arg8[%c0_44, %c0_45] : memref<128x1xf32, #tpu.memory_space<vmem>>, vector<128x1xf32>
      %97 = vector.shape_cast %96 : vector<128x1xf32> to vector<1x128x1xf32>
      %cst_46 = arith.constant dense<0.000000e+00> : vector<1xf32>
      %98 = vector.multi_reduction <add>, %97, %cst_46 [1, 2] : vector<1x128x1xf32> to vector<1xf32>
      %99 = vector.shape_cast %98 : vector<1xf32> to vector<1x1x1xf32>
      %100 = vector.extract %99[0, 0, 0] : f32 from vector<1x1x1xf32>
      %101 = tpu.iota {dimensions = array<i32: 2>} : vector<1x1x3xi32>
      %c0_i32_47 = arith.constant 0 : i32
      %102 = vector.broadcast %c0_i32_47 : i32 to vector<1x1x3xi32>
      %103 = arith.cmpi eq, %101, %102 : vector<1x1x3xi32>
      %c1_i32_48 = arith.constant 1 : i32
      %104 = vector.broadcast %c1_i32_48 : i32 to vector<1x1x3xi32>
      %105 = arith.cmpi eq, %101, %104 : vector<1x1x3xi32>
      %106 = vector.broadcast %95 : f32 to vector<1x1x3xf32>
      %107 = vector.broadcast %100 : f32 to vector<1x1x3xf32>
      %108 = arith.select %105, %106, %107 : vector<1x1x3xi1>, vector<1x1x3xf32>
      %109 = vector.broadcast %90 : f32 to vector<1x1x3xf32>
      %110 = arith.select %103, %109, %108 : vector<1x1x3xi1>, vector<1x1x3xf32>
      %c0_49 = arith.constant 0 : index
      %c0_50 = arith.constant 0 : index
      %c0_51 = arith.constant 0 : index
      %111 = vector.load %arg5[%c0_49, %c0_50, %c0_51] : memref<1x1x3xf32, #tpu.memory_space<vmem>>, vector<1x1x3xf32>
      tpu.vector_store %arg5[%c0_49, %c0_50, %c0_51], %110 {strides = array<i32>} : memref<1x1x3xf32, #tpu.memory_space<vmem>>, vector<1x1x3xf32>,
    } else {
    }
    return
  }
  func.func @transform_0(%arg0: i32, %arg1: i32) -> (i32, i32) {
    %c2_i32 = arith.constant 2 : i32
    %0 = arith.muli %arg0, %c2_i32 : i32
    %1 = arith.addi %0, %arg1 : i32
    %c3_i32 = arith.constant 3 : i32
    %2 = arith.minsi %1, %c3_i32 : i32
    %c0_i32 = arith.constant 0 : i32
    %c0_i32_0 = arith.constant 0 : i32
    return %2, %c0_i32 : i32, i32
  }
  func.func @transform_1(%arg0: i32, %arg1: i32) -> (i32, i32) {
    %c2_i32 = arith.constant 2 : i32
    %0 = arith.muli %arg0, %c2_i32 : i32
    %1 = arith.addi %0, %arg1 : i32
    %c3_i32 = arith.constant 3 : i32
    %2 = arith.minsi %1, %c3_i32 : i32
    %c0_i32 = arith.constant 0 : i32
    %c0_i32_0 = arith.constant 0 : i32
    return %c0_i32, %2 : i32, i32
  }
  func.func @transform_2(%arg0: i32, %arg1: i32) -> (i32, i32) {
    %c2_i32 = arith.constant 2 : i32
    %0 = arith.muli %arg0, %c2_i32 : i32
    %1 = arith.addi %0, %arg1 : i32
    %c3_i32 = arith.constant 3 : i32
    %2 = arith.minsi %1, %c3_i32 : i32
    %c0_i32 = arith.constant 0 : i32
    %c0_i32_0 = arith.constant 0 : i32
    return %2, %c0_i32 : i32, i32
  }
  func.func @transform_3(%arg0: i32, %arg1: i32) -> (i32, i32, i32) {
    %c0_i32 = arith.constant 0 : i32
    %c0_i32_0 = arith.constant 0 : i32
    %c0_i32_1 = arith.constant 0 : i32
    return %arg0, %c0_i32, %c0_i32_0 : i32, i32, i32
  }
}

</mosaic_0001>

<bundles_post_ra>
// kernel: tpu_custom_call.1
= control target key start
LH: loop header
LB: loop body
LE: loop exit
PB: predicated region body
PF: predicated region fallthrough
CT: control target
= control target key end

     0   :  { %8 = vsyncpa [#allocation6], 0  ;;  %s4184_s0 = inlined_call_operand.vmem [shape: f32[500,257], index: 0, kind: input, shape index: {}]   ;;  %s4185_s1 = inlined_call_operand.vmem [shape: f32[2,500], index: 1, kind: input, shape index: {}]   ;;  %s4186_s2 = inlined_call_operand.vmem [shape: f32[500,2], index: 2, kind: input, shape index: {}]   ;;  %s4187_s3 = inlined_call_operand.hbm [shape: f32[2,1,3], index: 3, kind: output, shape index: {}]  }
   0x1   :  { %10 = vsyncpa [#allocation6 + $0x1], 0  ;;  %s2914_s12 = smov 0   ;;  %s2916_s13 = smov 0  }
   0x2   :  { %s2918_s14 = smov 0   ;;  %s2920_s15 = smov 0  }
   0x3   :  { %s2922_s16 = smov 0   ;;  %s2924_s17 = smov 0  }
   0x4   :  { %s2926_s18 = smov 0   ;;  %s2928_s19 = smov 0  }
   0x5 LB: > { %4238 = sst [smem:[#allocation8_spill]] %s2882_s18  ;;  %s2151_s20 = sadd.s32 4294967295, %s2886_s19   ;;  %s2886_s19 = sphi %s2928_s19, %s16_s19   ;;  %s2882_s18 = sphi %s2926_s18, %s4412_s18   ;;  %s2878_s17 = sphi %s2924_s17, %s4417_s17   ;;  %s2874_s16 = sphi %s2922_s16, %s4410_s16   ;;  %s2870_s15 = sphi %s2920_s15, %s4416_s15   ;;  %s2866_s14 = sphi %s2918_s14, %s4415_s14   ;;  %s2862_s13 = sphi %s2916_s13, %s4414_s13   ;;  %s2858_s12 = sphi %s2914_s12, %s4413_s12  }
   0x6   : > { %s2152_s21 = sadd.s32 4294967294, %s2886_s19   ;;  %s25_s22 = sadd.s32 1, %s2878_s17 }
   0x7   : > { %p26_p0 = scmp.ge.s32.totalorder %s25_s22, 2  ;;  %s28_s23 = sadd.s32 1, %s2882_s18 }
   0x8   : > { %p147_p1 = scmp.ne.s32.totalorder %s2866_s14, %s2862_s13  ;;  %p148_p2 = scmp.eq.s32.totalorder %s2151_s20, 3 }
   0x9   : > { %s4419_s22 = smov (%p26_p0, %s25_s22), 0  ;;  %s4421_s23 = smov (!%p26_p0, %s28_s23), %s2882_s18 }
   0xa   : > { %4239 = sst [smem:[#allocation9_spill]] %s4419_s22  ;;  %p2963_p3 = por %p148_p2, %p147_p1 }
   0xb   : > { %p153_p4 = scmp.ne.s32.totalorder %s2862_s13, %s2858_s12  ;;  %p30_p5 = scmp.ge.s32.totalorder %s4421_s23, 2 }
   0xc   : > { %p154_p6 = scmp.eq.s32.totalorder %s2152_s21, 3  ;;  %p2161_p7 = scmp.ge.s32.totalorder %s2886_s19, 1 }
   0xd   : > { %p240_p8 = scmp.lt.s32.totalorder %s2886_s19, 5  ;;  %s4423_s23 = smov (%p30_p5, %s4421_s23), 0 }
   0xe   : > { %4241 = sst [smem:[#allocation10_spill]] %s4423_s23  ;;  %p2973_p9 = por %p154_p6, %p153_p4 }
   0xf   : > { %p241_p10 = pnand %p2161_p7, %p240_p8  ;;  %s134_s26 = ssub.s32 %s2882_s18, %s4423_s23 }
  0x10   : > { %s137_s27 = sadd.s32 1, %s2866_s14  ;;  %p135_p11 = scmp.eq.s32.totalorder %s134_s26, 0 }
  0x11   : > { %244 = sbr.rel (%p241_p10) target bundleno = 800 (0x320), region = 32 }
  0x12   : > { %s2981_s28 = scalar_select %p135_p11, %s2866_s14, %s137_s27  }
  0x16   : > { %s2162_s30 = sshll.u32 %s2874_s16, 1  ;;  %s4243_s22 = sand.u32 1, %s2862_s13  }
  0x17   : > { %s2986_s4 = sadd.s32 %s2870_s15, %s2162_s30  ;;  %s3007_s18 = scalar_lea.vmem [#allocation5], %s4243_s22 }
  0x18   : > { %p296_p12 = scmp.lt.s32.totalorder %s2986_s4, 3  ;;  %p2173_p0 = scmp.ne.s32.totalorder %s2870_s15, 0 }
  0x1a   : > { %s297_s5 = scalar_select %p296_p12, %s2986_s4, 3 }
  0x1c   : > { %s2163_s6 = sshll.u32 %s297_s5, 4  ;;  %s4425_s5 = smov (!%p296_p12, %s297_s5), 3 }
  0x1d   : > { %p304_p13 = scmp.lt.s32.totalorder %s2163_s6, 62  ;;  %s2169_s7 = sshll.u32 %s4425_s5, 1 }
  0x1e   : > { %s2993_s11 = scalar_lea.vmem %s4185_s1, %s2169_s7  ;;  %356 = sbr.rel (%p2173_p0) target bundleno = 53 (0x35), region = 36 }
  0x1f   : > { %s4427_s6 = smov (!%p304_p13, %s2163_s6), 62 }
  0x20   : > { %s2494_s8 = smul.u32 24, %s4427_s6  ;;  %s2172_s20 = sshll.u32 %s4427_s6, 3 }
  0x21   : > { %s3003_s23 = scalar_lea.vmem %s4186_s2, %s2172_s20 }
  0x22   : > { %s2998_s27 = scalar_lea.vmem %s4184_s0, %s2494_s8 }
  0x23   : > { %vm358_vm0 = vcmask 7168   ;;  %v2888_v0 = vmov 0.0  }
  0x24   : > { %357 = vst [vmem:[#allocation2] sm:$0x1] %v2888_v0  ;;  %359 = vst.msk [vmem:[#allocation3] sm:$0xff] %vm358_vm0, %v2888_v0 }
  0x25   : > { %360 = vst.msk [vmem:[#allocation3 + $0x8] sm:$0xff] %vm358_vm0, %v2888_v0  ;;  %361 = vst.msk [vmem:[#allocation3 + $0x10] sm:$0xff] %vm358_vm0, %v2888_v0 }
  0x26   : > { %362 = vst.msk [vmem:[#allocation3 + $0x18] sm:$0xff] %vm358_vm0, %v2888_v0  ;;  %363 = vst.msk [vmem:[#allocation3 + $0x20] sm:$0xff] %vm358_vm0, %v2888_v0 }
  0x27   : > { %364 = vst.msk [vmem:[#allocation3 + $0x28] sm:$0xff] %vm358_vm0, %v2888_v0  ;;  %365 = vst.msk [vmem:[#allocation3 + $0x30] sm:$0xff] %vm358_vm0, %v2888_v0 }
  0x28   : > { %366 = vst.msk [vmem:[#allocation3 + $0x38] sm:$0xff] %vm358_vm0, %v2888_v0  ;;  %367 = vst.msk [vmem:[#allocation3 + $0x40] sm:$0xff] %vm358_vm0, %v2888_v0 }
  0x29   : > { %368 = vst.msk [vmem:[#allocation3 + $0x48] sm:$0xff] %vm358_vm0, %v2888_v0  ;;  %369 = vst.msk [vmem:[#allocation3 + $0x50] sm:$0xff] %vm358_vm0, %v2888_v0 }
  0x2a   : > { %370 = vst.msk [vmem:[#allocation3 + $0x58] sm:$0xff] %vm358_vm0, %v2888_v0  ;;  %371 = vst.msk [vmem:[#allocation3 + $0x60] sm:$0xff] %vm358_vm0, %v2888_v0 }
  0x2b   : > { %372 = vst.msk [vmem:[#allocation3 + $0x68] sm:$0xff] %vm358_vm0, %v2888_v0  ;;  %373 = vst.msk [vmem:[#allocation3 + $0x70] sm:$0xff] %vm358_vm0, %v2888_v0 }
  0x2c   : > { %374 = vst.msk [vmem:[#allocation3 + $0x78] sm:$0xff] %vm358_vm0, %v2888_v0  ;;  %375 = vst.msk [vmem:[#allocation4] sm:$0xff] %vm358_vm0, %v2888_v0 }
  0x2d   : > { %376 = vst.msk [vmem:[#allocation4 + $0x8] sm:$0xff] %vm358_vm0, %v2888_v0  ;;  %377 = vst.msk [vmem:[#allocation4 + $0x10] sm:$0xff] %vm358_vm0, %v2888_v0 }
  0x2e   : > { %378 = vst.msk [vmem:[#allocation4 + $0x18] sm:$0xff] %vm358_vm0, %v2888_v0  ;;  %379 = vst.msk [vmem:[#allocation4 + $0x20] sm:$0xff] %vm358_vm0, %v2888_v0 }
  0x2f   : > { %380 = vst.msk [vmem:[#allocation4 + $0x28] sm:$0xff] %vm358_vm0, %v2888_v0  ;;  %381 = vst.msk [vmem:[#allocation4 + $0x30] sm:$0xff] %vm358_vm0, %v2888_v0 }
  0x30   : > { %382 = vst.msk [vmem:[#allocation4 + $0x38] sm:$0xff] %vm358_vm0, %v2888_v0  ;;  %383 = vst.msk [vmem:[#allocation4 + $0x40] sm:$0xff] %vm358_vm0, %v2888_v0 }
  0x31   : > { %384 = vst.msk [vmem:[#allocation4 + $0x48] sm:$0xff] %vm358_vm0, %v2888_v0  ;;  %385 = vst.msk [vmem:[#allocation4 + $0x50] sm:$0xff] %vm358_vm0, %v2888_v0 }
  0x32   : > { %386 = vst.msk [vmem:[#allocation4 + $0x58] sm:$0xff] %vm358_vm0, %v2888_v0  ;;  %387 = vst.msk [vmem:[#allocation4 + $0x60] sm:$0xff] %vm358_vm0, %v2888_v0 }
  0x33   : > { %388 = vst.msk [vmem:[#allocation4 + $0x68] sm:$0xff] %vm358_vm0, %v2888_v0  ;;  %389 = vst.msk [vmem:[#allocation4 + $0x70] sm:$0xff] %vm358_vm0, %v2888_v0 }
  0x34   : > { %390 = vst.msk [vmem:[#allocation4 + $0x78] sm:$0xff] %vm358_vm0, %v2888_v0 }
  0x35 PF: > { %v400_v1 = vld [vmem:[%s2998_s27 + $0x30] sm:$0xff]  ;;  %v3044_v2 = vld [vmem:[%s2998_s27 + $0x40] sm:$0xff]  ;;  %v4190_v3 = vlaneseq  ;;  %vm4207_vm1 = vcmask 7168   ;;  %v3047_v4 = vld [vmem:[%s2998_s27 + $0x38] sm:$0xff]  ;;  %v2889_v7 = vmov 1   ;;  %v4198_v12 = vmov 1.0  }
  0x36   : > { %v3050_v5 = vld [vmem:[%s2998_s27] sm:$0xff]  ;;  %v3053_v6 = vld [vmem:[%s2998_s27 + $0x10] sm:$0xff]  ;;  %2610 = vset.pattern.permute.xlu1 %v2889_v7  ;;  %2609 = vset.pattern.permute.xlu0 %v2889_v7  ;;  %v3059_v9 = vld [vmem:[%s2998_s27 + $0x8] sm:$0xff]  ;;  %v570_v13 = vsel %vm4207_vm1, %v3044_v2, -inf  ;;  %vm4204_vm3 = vcmask 1040384   ;;  %s2175_s22 = sshll.u32 %s2986_s4, 7 }
  0x37   : > { %4244 = vst [vmem:[#allocation11_spill] sm:$0xff] %v3050_v5  ;;  %v3056_v8 = vand.u32 127, %v4190_v3  ;;  %v403_v10 = vld [vmem:[%s2998_s27 + $0x48] sm:$0xff]  ;;  %v3063_v11 = vld [vmem:[%s2998_s27 + $0x58] sm:$0xff]  ;;  %2246 = vmatprep.subr.mxu0 %v4198_v12  ;;  %v3069_v14 = vld [vmem:[%s2998_s27 + $0x50] sm:$0xff]  ;;  %v560_v17 = vsel %vm4207_vm1, %v3053_v6, -inf }
  0x38   : > { %v3072_v15 = vld [vmem:[%s2998_s27 + $0x18] sm:$0xff]  ;;  %v3075_v16 = vld [vmem:[%s2998_s27 + $0x28] sm:$0xff]  ;;  %2247 = vmatpush3.msra.mxu0 %v4198_v12  ;;  %v575_v18 = vsel %vm4207_vm1, %v3063_v11, -inf  ;;  %v3084_v19 = vld [vmem:[%s2998_s27 + $0x20] sm:$0xff]  ;;  %p2242_p1 = scmp.ne.s32.totalorder %s2870_s15, 1 }
  0x39   : > { %4245 = vst [vmem:[#allocation12_spill] sm:$0xff] %v3056_v8  ;;  %4246 = vst [vmem:[#allocation13_spill] sm:$0xff] %v3072_v15  ;;  %vm507_vm2 = vcmp.ge.s32.totalorder %v3056_v8, 1  ;;  %v565_v20 = vsel %vm4207_vm1, %v3075_v16, -inf  ;;  %v409_v21 = vld [vmem:[%s2998_s27 + $0x78] sm:$0xff]  ;;  %2248 = vmatprep.subr.mxu0 %v4198_v12  ;;  %v3116_v29 = vld [vmem:[%s2998_s27 + $0x80] sm:$0xff] }
  0x3a   : > { %v3092_v22 = vsel %vm507_vm2, %v400_v1, -1e+30  ;;  %v3097_v23 = vsel %vm507_vm2, %v3050_v5, -1e+30  ;;  %v3101_v24 = vsel %vm507_vm2, %v403_v10, -1e+30  ;;  %2249 = vmatpush3.msra.mxu0 %v4198_v12 }
  0x3b   : > { %v569_v25 = vmax.f32 %v3092_v22, %v3047_v4  ;;  %v558_v26 = vmax.f32 %v3097_v23, %v3059_v9  ;;  %v574_v27 = vmax.f32 %v3101_v24, %v3069_v14  ;;  %v3113_v28 = vsel %vm507_vm2, %v3072_v15, -1e+30  ;;  %v3119_v30 = vld [vmem:[%s2998_s27 + $0x88] sm:$0xff]  ;;  %v3122_v31 = vld [vmem:[%s2998_s27 + $0x60] sm:$0xff]  ;;  %2250 = vmatprep.subr.mxu0 %v4198_v12  ;;  %v3142_v39 = vld [vmem:[%s2998_s27 + $0x70] sm:$0xff] }
  0x3c   : > { %4247 = vst [vmem:[#allocation14_spill] sm:$0xff] %v3122_v31  ;;  %v564_v32 = vmax.f32 %v3113_v28, %v3084_v19  ;;  %v3129_v33 = vsel %vm507_vm2, %v409_v21, -1e+30  ;;  %v3132_v34 = vld [vmem:[%s2998_s27 + $0x68] sm:$0xff]  ;;  %v3137_v35 = vsel %vm507_vm2, %v3122_v31, -1e+30  ;;  %2251 = vmatpush3.msra.mxu0 %v4198_v12 }
  0x3d   : > { %v415_v36 = vld [vmem:[%s2998_s27 + $0xa8] sm:$0xff]  ;;  %v571_v37 = vmax.f32 %v569_v25, %v570_v13  ;;  %v561_v38 = vmax.f32 %v558_v26, %v560_v17  ;;  %v412_v40 = vld [vmem:[%s2998_s27 + $0x90] sm:$0xff]  ;;  %2252 = vmatprep.subr.mxu0 %v4198_v12  ;;  %v584_v41 = vmax.f32 %v3129_v33, %v3116_v29  ;;  %v585_v42 = vsel %vm4207_vm1, %v3119_v30, -inf  ;;  %v3163_v49 = vld [vmem:[%s2998_s27 + $0xb8] sm:$0xff] }
  0x3e   : > { %2253 = vmatpush3.msra.mxu0 %v4198_v12  ;;  %v576_v43 = vmax.f32 %v574_v27, %v575_v18  ;;  %v566_v44 = vmax.f32 %v564_v32, %v565_v20  ;;  %v579_v45 = vmax.f32 %v3137_v35, %v3132_v34  ;;  %v3154_v46 = vld [vmem:[%s2998_s27 + $0xb0] sm:$0xff]  ;;  %v3158_v47 = vsel %vm507_vm2, %v415_v36, -1e+30  ;;  %v3166_v50 = vld [vmem:[%s2998_s27 + $0x98] sm:$0xff]  ;;  %v3175_v53 = vld [vmem:[%s2998_s27 + $0xa0] sm:$0xff] }
  0x3f   : > { %572 = vmax.xlane.f32.xlu1 %v571_v37  ;;  %562 = vmax.xlane.f32.xlu0 %v561_v38  ;;  %v580_v48 = vsel %vm4207_vm1, %v3142_v39, -inf  ;;  %v3170_v51 = vsel %vm507_vm2, %v412_v40, -1e+30  ;;  %v421_v52 = vld [vmem:[%s2998_s27 + $0xd8] sm:$0xff]  ;;  %v418_v54 = vld [vmem:[%s2998_s27 + $0xc0] sm:$0xff]  ;;  %v586_v55 = vmax.f32 %v584_v41, %v585_v42  ;;  %v594_v56 = vmax.f32 %v3158_v47, %v3154_v46  ;;  %v3196_v63 = vld [vmem:[%s2998_s27 + $0xe8] sm:$0xff] }
  0x40   : > { %2254 = vmatprep.subr.mxu0 %v4198_v12  ;;  %v581_v57 = vmax.f32 %v579_v45, %v580_v48  ;;  %v595_v58 = vsel %vm4207_vm1, %v3163_v49, -inf  ;;  %v589_v59 = vmax.f32 %v3170_v51, %v3166_v50  ;;  %v3187_v60 = vld [vmem:[%s2998_s27 + $0xe0] sm:$0xff]  ;;  %v3191_v61 = vsel %vm507_vm2, %v421_v52, -1e+30  ;;  %v3199_v0 = vld [vmem:[%s2998_s27 + $0xc8] sm:$0xff]  ;;  %v3202_v1 = vld [vmem:[%s2998_s27 + $0xd0] sm:$0xff] }
  0x41   : > { %2255 = vmatpush3.msra.mxu0 %v4198_v12  ;;  %v590_v62 = vsel %vm4207_vm1, %v3175_v53, -inf  ;;  %v3206_v7 = vsel %vm507_vm2, %v418_v54, -1e+30  ;;  %v427_v10 = vld [vmem:[%s2998_s27 + $0x108] sm:$0xff]  ;;  %v424_v13 = vld [vmem:[%s2998_s27 + $0xf0] sm:$0xff]  ;;  %v596_v17 = vmax.f32 %v594_v56, %v595_v58  ;;  %v604_v18 = vmax.f32 %v3191_v61, %v3187_v60  ;;  %v3229_v36 = vld [vmem:[%s2998_s27 + $0xf8] sm:$0xff] }
  0x42   : > { %2256 = vmatprep.subr.mxu0 %v4198_v12  ;;  %v591_v20 = vmax.f32 %v589_v59, %v590_v62  ;;  %v605_v21 = vsel %vm4207_vm1, %v3196_v63, -inf  ;;  %v599_v25 = vmax.f32 %v3206_v7, %v3199_v0  ;;  %v600_v26 = vsel %vm4207_vm1, %v3202_v1, -inf  ;;  %v3222_v27 = vld [vmem:[%s2998_s27 + $0x110] sm:$0xff]  ;;  %v433_v38 = vld [vmem:[%s2998_s27 + $0x138] sm:$0xff]  ;;  %v3241_v41 = vld [vmem:[%s2998_s27 + $0x100] sm:$0xff] }
  0x43   : > { %577 = vmax.xlane.f32.xlu1 %v576_v43  ;;  %567 = vmax.xlane.f32.xlu0 %v566_v44  ;;  %v3226_v32 = vsel %vm507_vm2, %v427_v10, -1e+30  ;;  %v3233_v37 = vsel %vm507_vm2, %v424_v13, -1e+30  ;;  %v3238_v40 = vld [vmem:[%s2998_s27 + $0x118] sm:$0xff]  ;;  %v430_v42 = vld [vmem:[%s2998_s27 + $0x120] sm:$0xff]  ;;  %v606_v43 = vmax.f32 %v604_v18, %v605_v21 }
  0x44   : > { %2257 = vmatpush3.msra.mxu0 %v4198_v12  ;;  %v601_v44 = vmax.f32 %v599_v25, %v600_v26  ;;  %v614_v45 = vmax.f32 %v3226_v32, %v3222_v27  ;;  %v609_v48 = vmax.f32 %v3233_v37, %v3229_v36  ;;  %v3251_v52 = vld [vmem:[%s2998_s27 + $0x140] sm:$0xff]  ;;  %v3255_v54 = vsel %vm507_vm2, %v433_v38, -1e+30  ;;  %v3265_v58 = vld [vmem:[%s2998_s27 + $0x128] sm:$0xff]  ;;  %v3273_v62 = vld [vmem:[%s2998_s27 + $0x130] sm:$0xff] }
  0x45   : > { %2258 = vmatprep.subr.mxu0 %v4198_v12  ;;  %4248 = vst [vmem:[#allocation15_spill] sm:$0xff] %v3251_v52  ;;  %4249 = vst [vmem:[#allocation16_spill] sm:$0xff] %v3255_v54  ;;  %v610_v56 = vsel %vm4207_vm1, %v3241_v41, -inf  ;;  %v3269_v59 = vsel %vm507_vm2, %v430_v42, -1e+30  ;;  %v439_v10 = vld [vmem:[%s2998_s27 + $0x168] sm:$0xff] }
  0x46   : > { %2259 = vmatpush3.msra.mxu0 %v4198_v12  ;;  %4250 = vst [vmem:[#allocation17_spill] sm:$0xff] %v3269_v59  ;;  %v436_v13 = vld [vmem:[%s2998_s27 + $0x150] sm:$0xff]  ;;  %v619_v25 = vmax.f32 %v3269_v59, %v3265_v58  ;;  %v620_v38 = vsel %vm4207_vm1, %v3273_v62, -inf  ;;  %v3292_v42 = vsel %vm507_vm2, %v439_v10, -1e+30  ;;  %v3295_v3 = vld [vmem:[%s2998_s27 + $0x158] sm:$0xff] }
  0x47   : > { %587 = vmax.xlane.f32.xlu1 %v586_v55  ;;  %582 = vmax.xlane.f32.xlu0 %v581_v57  ;;  %v615_v55 = vsel %vm4207_vm1, %v3238_v40, -inf  ;;  %v3262_v57 = vld [vmem:[%s2998_s27 + $0x148] sm:$0xff]  ;;  %v3286_v26 = vld [vmem:[%s2998_s27 + $0x170] sm:$0xff]  ;;  %4252 = vst [vmem:[#allocation19_spill] sm:$0xff] %v3292_v42  ;;  %4253 = vst [vmem:[#allocation20_spill] sm:$0xff] %v3295_v3 }
  0x48   : > { %2260 = vmatprep.subr.mxu0 %v4198_v12  ;;  %v616_v18 = vmax.f32 %v614_v45, %v615_v55  ;;  %v625_v21 = vsel %vm4207_vm1, %v3262_v57, -inf  ;;  %4251 = vst [vmem:[#allocation18_spill] sm:$0xff] %v3286_v26  ;;  %v3306_v45 = vld [vmem:[%s2998_s27 + $0x160] sm:$0xff]  ;;  %v621_v55 = vmax.f32 %v619_v25, %v620_v38  ;;  %v448_v15 = vld [vmem:[%s3003_s23 + $0x28] sm:$0xff] }
  0x49   : > { %2261 = vmatpush3.msra.mxu0 %v4198_v12  ;;  %v630_v31 = vsel %vm4207_vm1, %v3306_v45, -inf  ;;  %v443_v25 = vld [vmem:[%s3003_s23] sm:$0xff] }
  0x4a   : > { %2262 = vmatprep.subr.mxu0 %v4198_v12 }
  0x4b   : > { %597 = vmax.xlane.f32.xlu1 %v596_v17  ;;  %592 = vmax.xlane.f32.xlu0 %v591_v20  ;;  %v624_v17 = vmax.f32 %v3255_v54, %v3251_v52  ;;  %v611_v20 = vmax.f32 %v609_v48, %v610_v56  ;;  %v634_v56 = vmax.f32 %v3292_v42, %v3286_v26  ;;  %v456_v52 = vld [vmem:[%s3003_s23 + $0x68] sm:$0xff] }
  0x4c   : > { %2263 = vmatpush3.msra.mxu0 %v4198_v12 }
  0x4d   : > { %2264 = vmatprep.subr.mxu0 %v4198_v12  ;;  %v626_v48 = vmax.f32 %v624_v17, %v625_v21  ;;  %v445_v21 = vld [vmem:[%s3003_s23 + $0x10] sm:$0xff] }
  0x4e   : > { %2265 = vmatpush3.msra.mxu0 %v4198_v12 }
  0x4f   : > { %607 = vmax.xlane.f32.xlu1 %v606_v43  ;;  %602 = vmax.xlane.f32.xlu0 %v601_v44  ;;  %v3299_v43 = vsel %vm507_vm2, %v436_v13, -1e+30  ;;  %v3303_v44 = vld [vmem:[%s2998_s27 + $0x178] sm:$0xff] }
  0x50   : > { %4254 = vst [vmem:[#allocation21_spill] sm:$0xff] %v3299_v43  ;;  %2266 = vmatprep.subr.mxu0 %v4198_v12  ;;  %v629_v10 = vmax.f32 %v3299_v43, %v3295_v3  ;;  %v635_v13 = vsel %vm4207_vm1, %v3303_v44, -inf  ;;  %v447_v43 = vld [vmem:[%s3003_s23 + $0x20] sm:$0xff]  ;;  %v454_v3 = vld [vmem:[%s3003_s23 + $0x58] sm:$0xff] }
  0x51   : > { %2267 = vmatpush3.msra.mxu0 %v4198_v12  ;;  %v636_v17 = vmax.f32 %v634_v56, %v635_v13  ;;  %v446_v56 = vld [vmem:[%s3003_s23 + $0x18] sm:$0xff] }
  0x52   : > { %2268 = vmatprep.subr.mxu0 %v4198_v12 }
  0x53   : > { %617 = vmax.xlane.f32.xlu1 %v616_v18  ;;  %612 = vmax.xlane.f32.xlu0 %v611_v20  ;;  %v631_v18 = vmax.f32 %v629_v10, %v630_v31  ;;  %v444_v20 = vld [vmem:[%s3003_s23 + $0x8] sm:$0xff] }
  0x54   : > { %2269 = vmatpush3.msra.mxu0 %v4198_v12  ;;  %v2497_v31 = vtrunc.f32 %v444_v20  ;;  %v452_v10 = vld [vmem:[%s3003_s23 + $0x48] sm:$0xff] }
  0x55   : > { %2270 = vmatprep.subr.mxu0 %v4198_v12  ;;  %v2513_v26 = vtrunc.f32 %v452_v10  ;;  %v2521_v10 = vtrunc.f32 %v456_v52 }
  0x56   : > { %2271 = vmatpush3.msra.mxu0 %v4198_v12  ;;  %v2498_v38 = vcvt.f32.s32 %v2497_v31 }
  0x57   : > { %627 = vmax.xlane.f32.xlu1 %v626_v48  ;;  %622 = vmax.xlane.f32.xlu0 %v621_v55  ;;  %v2499_v48 = vtrunc.f32 %v445_v21  ;;  %v2495_v55 = vtrunc.f32 %v443_v25  ;;  %v2514_v21 = vcvt.f32.s32 %v2513_v26  ;;  %v2517_v25 = vtrunc.f32 %v454_v3 }
  0x58   : > { %2272 = vmatprep.subr.mxu0 %v4198_v12  ;;  %v1142_v13 = vadd.s32 1, %v2498_v38  ;;  %v2522_v3 = vcvt.f32.s32 %v2521_v10 }
  0x59   : > { %2273 = vmatpush3.msra.mxu0 %v4198_v12  ;;  %v2496_v42 = vcvt.f32.s32 %v2495_v55  ;;  %v1150_v55 = vadd.s32 1, %v2514_v21  ;;  %v451_v21 = vld [vmem:[%s3003_s23 + $0x40] sm:$0xff] }
  0x5a   : > { %2274 = vmatprep.subr.mxu0 %v4198_v12 }
  0x5b   : > { %637 = vmax.xlane.f32.xlu1 %v636_v17  ;;  %632 = vmax.xlane.f32.xlu0 %v631_v18  ;;  %v2500_v17 = vcvt.f32.s32 %v2499_v48  ;;  %v2501_v18 = vtrunc.f32 %v446_v56  ;;  %v1141_v31 = vadd.s32 1, %v2496_v42  ;;  %v2505_v48 = vtrunc.f32 %v448_v15 }
  0x5c   : > { %2275 = vmatpush3.msra.mxu0 %v4198_v12  ;;  %v2518_v56 = vcvt.f32.s32 %v2517_v25 }
  0x5d   : > { %2276 = vmatprep.subr.mxu0 %v4198_v12  ;;  %v1143_v54 = vadd.s32 1, %v2500_v17  ;;  %v2502_v20 = vcvt.f32.s32 %v2501_v18  ;;  %v458_v17 = vld [vmem:[%s3003_s23 + $0x78] sm:$0xff]  ;;  %v2506_v5 = vcvt.f32.s32 %v2505_v48  ;;  %v2511_v48 = vtrunc.f32 %v451_v21 }
  0x5e   : > { %2277 = vmatpush3.msra.mxu0 %v4198_v12  ;;  %v2503_v12 = vtrunc.f32 %v447_v43  ;;  %v1152_v26 = vadd.s32 1, %v2518_v56  ;;  %v2525_v42 = vtrunc.f32 %v458_v17  ;;  %v453_v56 = vld [vmem:[%s3003_s23 + $0x50] sm:$0xff]  ;;  %v455_v17 = vld [vmem:[%s3003_s23 + $0x60] sm:$0xff] }
  0x5f   : > { %v1144_v59 = vadd.s32 1, %v2502_v20  ;;  %v1146_v15 = vadd.s32 1, %v2506_v5  ;;  %v1154_v20 = vadd.s32 1, %v2522_v3  ;;  %v2512_v5 = vcvt.f32.s32 %v2511_v48  ;;  %v457_v3 = vld [vmem:[%s3003_s23 + $0x70] sm:$0xff] }
  0x60   : > { %v2504_v38 = vcvt.f32.s32 %v2503_v12  ;;  %v4255_v12 = vmov 1.0  }
  0x61   : > { %2440 = vmatprep.subr.msk.mxu1 %vm4204_vm3, %v4255_v12  ;;  %2466 = vmatprep.subr.msk.mxu0 %vm4204_vm3, %v4255_v12 }
  0x62   : > { %v1145_v18 = vadd.s32 1, %v2504_v38  ;;  %2441 = vmatpush3.msk.msra.mxu1 %vm4204_vm3, %v4255_v12 }
  0x63   : > { %2343 = vmatprep.subr.mxu1 %v4255_v12 }
  0x6c   : > { %1161 = vperm.xlu1 %2610, %v1142_v13   ;;  %v449_v13 = vld [vmem:[%s3003_s23 + $0x30] sm:$0xff] }
  0x6d   : > { %v2507_v43 = vtrunc.f32 %v449_v13  ;;  %v2515_v13 = vtrunc.f32 %v453_v56 }
  0x6f   : > { %v2508_v52 = vcvt.f32.s32 %v2507_v43  ;;  %v2516_v43 = vcvt.f32.s32 %v2515_v13 }
  0x70   : > { %1164 = vperm.xlu1 %2610, %v1143_v54   ;;  %v450_v54 = vld [vmem:[%s3003_s23 + $0x38] sm:$0xff] }
  0x71   : > { %1158 = vperm.xlu0 %2609, %v1141_v31   ;;  %v2526_v31 = vcvt.f32.s32 %v2525_v42  ;;  %v1147_v25 = vadd.s32 1, %v2508_v52  ;;  %v1151_v42 = vadd.s32 1, %v2516_v43 }
  0x74   : > { %1167 = vperm.xlu1 %2610, %v1144_v59   ;;  %v2509_v59 = vtrunc.f32 %v450_v54 }
  0x75   : > { %1185 = vperm.xlu0 %2609, %v1150_v55   ;;  %v1156_v55 = vadd.s32 1, %v2526_v31 }
  0x76   : > { %v2510_v38 = vcvt.f32.s32 %v2509_v59 }
  0x78   : > { %1170 = vperm.xlu1 %2610, %v1145_v18   ;;  %v1148_v10 = vadd.s32 1, %v2510_v38  ;;  %v1149_v18 = vadd.s32 1, %v2512_v5 }
  0x79   : > { %1191 = vperm.xlu0 %2609, %v1152_v26   ;;  %v2519_v26 = vtrunc.f32 %v455_v17 }
  0x7b   : > { %v2520_v54 = vcvt.f32.s32 %v2519_v26 }
  0x7c   : > { %1173 = vperm.xlu1 %2610, %v1146_v15   ;;  %v2523_v15 = vtrunc.f32 %v457_v3 }
  0x7d   : > { %1197 = vperm.xlu0 %2609, %v1154_v20   ;;  %v1153_v52 = vadd.s32 1, %v2520_v54 }
  0x7e   : > { %v2524_v59 = vcvt.f32.s32 %v2523_v15 }
  0x80   : > { %1176 = vperm.xlu1 %2610, %v1147_v25   ;;  %v1155_v20 = vadd.s32 1, %v2524_v59 }
  0x81   : > { %1203 = vperm.xlu0 %2609, %v1156_v55  }
  0x84   : > { %1179 = vperm.xlu1 %2610, %v1148_v10  }
  0x88   : > { %1182 = vperm.xlu1 %2610, %v1149_v18  }
  0x8c   : > { %1188 = vperm.xlu1 %2610, %v1151_v42  }
  0x90   : > { %1194 = vperm.xlu1 %2610, %v1153_v52  }
  0x94   : > { %1200 = vperm.xlu1 %2610, %v1155_v20  }
  0xc8   : > { %v3350_v31 = vpop.xlane.xlu1 %572  ;;  %v3352_v21 = vpop.xlane.xlu0 %562 }
  0xc9   : > { %v641_v25 = vsub.f32 %v3053_v6, %v3352_v21  ;;  %v647_v56 = vsub.f32 %v3044_v2, %v3350_v31 }
  0xcb   : > { %v691_v48 = vmul.f32 1.442695, %v641_v25  ;;  %v703_v13 = vmul.f32 1.442695, %v647_v56  ;;  %v640_v25 = vsub.f32 %v3059_v9, %v3352_v21 }
  0xcc   : > { %v3356_v38 = vpop.xlane.xlu0 %567  ;;  %v3358_v55 = vpop.xlane.xlu1 %577 }
  0xcd   : > { %v644_v10 = vsub.f32 %v3075_v16, %v3356_v38  ;;  %2611 = vpow2.f32 %v691_v48  ;;  %v650_v5 = vsub.f32 %v3063_v11, %v3358_v55  ;;  %v643_v52 = vsub.f32 %v3084_v19, %v3356_v38 }
  0xce   : > { %2613 = vpow2.f32 %v703_v13 }
  0xcf   : > { %v697_v18 = vmul.f32 1.442695, %v644_v10  ;;  %v709_v26 = vmul.f32 1.442695, %v650_v5  ;;  %v695_v10 = vmul.f32 1.442695, %v643_v52  ;;  %v649_v52 = vsub.f32 %v3069_v14, %v3358_v55 }
  0xd0   : > { %v3366_v17 = vpop.xlane.xlu0 %582  ;;  %v3368_v6 = vpop.xlane.xlu1 %587 }
  0xd1   : > { %v656_v43 = vsub.f32 %v3119_v30, %v3368_v6  ;;  %v653_v2 = vsub.f32 %v3142_v39, %v3366_v17  ;;  %2615 = vpow2.f32 %v697_v18  ;;  %v639_v30 = vsub.f32 %v3097_v23, %v3352_v21 }
  0xd2   : > { %2617 = vpow2.f32 %v709_v26  ;;  %v689_v18 = vmul.f32 1.442695, %v640_v25 }
  0xd3   : > { %v721_v16 = vmul.f32 1.442695, %v656_v43  ;;  %v715_v11 = vmul.f32 1.442695, %v653_v2  ;;  %v687_v23 = vmul.f32 1.442695, %v639_v30  ;;  %v646_v2 = vsub.f32 %v3047_v4, %v3350_v31 }
  0xd4   : > { %v3374_v3 = vpop.xlane.xlu0 %592  ;;  %v3376_v42 = vpop.xlane.xlu1 %597 }
  0xd5   : > { %4256 = vst [vmem:[#allocation22_spill] sm:$0xff] %v3374_v3  ;;  %4257 = vst [vmem:[#allocation23_spill] sm:$0xff] %v3376_v42  ;;  %v662_v54 = vsub.f32 %v3163_v49, %v3376_v42  ;;  %v659_v15 = vsub.f32 %v3175_v53, %v3374_v3  ;;  %2619 = vpow2.f32 %v721_v16  ;;  %v642_v53 = vsub.f32 %v3113_v28, %v3356_v38 }
  0xd6   : > { %2621 = vpow2.f32 %v715_v11  ;;  %v645_v11 = vsub.f32 %v3092_v22, %v3350_v31 }
  0xd7   : > { %v733_v59 = vmul.f32 1.442695, %v662_v54  ;;  %v727_v20 = vmul.f32 1.442695, %v659_v15  ;;  %v693_v26 = vmul.f32 1.442695, %v642_v53  ;;  %v652_v53 = vsub.f32 %v3132_v34, %v3366_v17 }
  0xd8   : > { %v3389_v49 = vpop.xlane.xlu0 %602  ;;  %v3393_v48 = vpop.xlane.xlu1 %607 }
  0xd9   : > { %4258 = vst [vmem:[#allocation24_spill] sm:$0xff] %v3389_v49  ;;  %4259 = vst [vmem:[#allocation25_spill] sm:$0xff] %v3393_v48  ;;  %v668_v56 = vsub.f32 %v3196_v63, %v3393_v48  ;;  %2623 = vpow2.f32 %v733_v59  ;;  %v665_v5 = vsub.f32 %v3202_v1, %v3389_v49 }
  0xda   : > { %v2612_v39 = vpop.eup %2611  ;;  %2625 = vpow2.f32 %v727_v20 }
  0xdb   : > { %2442 = vmatprep.mubr.msk.f32.mxu1 %vm4207_vm1, %v2612_v39  ;;  %v2614_v13 = vpop.eup %2613  ;;  %2627 = vpow2.f32 %v687_v23  ;;  %v745_v28 = vmul.f32 1.442695, %v668_v56  ;;  %v739_v1 = vmul.f32 1.442695, %v665_v5  ;;  %v701_v39 = vmul.f32 1.442695, %v646_v2 }
  0xdc   : > { %v3402_v16 = vpop.xlane.xlu0 %612  ;;  %2629 = vpow2.f32 %v695_v10  ;;  %v3406_v54 = vpop.xlane.xlu1 %617  ;;  %v707_v10 = vmul.f32 1.442695, %v649_v52  ;;  %v655_v2 = vsub.f32 %v3116_v29, %v3368_v6 }
  0xdd   : > { %4260 = vst [vmem:[#allocation26_spill] sm:$0xff] %v3402_v16  ;;  %4261 = vst [vmem:[#allocation27_spill] sm:$0xff] %v3406_v54  ;;  %2631 = vpow2.f32 %v689_v18  ;;  %v674_v15 = vsub.f32 %v3238_v40, %v3406_v54  ;;  %v671_v30 = vsub.f32 %v3241_v41, %v3402_v16  ;;  %v699_v40 = vmul.f32 1.442695, %v645_v11 }
  0xde   : > { %v2616_v43 = vpop.eup %2615  ;;  %2633 = vpow2.f32 %v693_v26  ;;  %v648_v41 = vsub.f32 %v3101_v24, %v3358_v55  ;;  %v651_v26 = vsub.f32 %v3137_v35, %v3366_v17  ;;  %v654_v11 = vsub.f32 %v3129_v33, %v3368_v6 }
  0xdf   : > { %2443 = vmatmul.mubr.msk.f32.vlgmr.msra.gmra.mxu1 %vm4207_vm1, %v2616_v43  ;;  %v2618_v63 = vpop.eup %2617  ;;  %2635 = vpow2.f32 %v745_v28  ;;  %v757_v20 = vmul.f32 1.442695, %v674_v15  ;;  %v751_v23 = vmul.f32 1.442695, %v671_v30  ;;  %v719_v52 = vmul.f32 1.442695, %v655_v2 }
  0xe0   : > { %2344 = vmatpush3.msra.mxu1 %v4255_v12  ;;  %2445 = vmatprep.mubr.msk.f32.mxu1 %vm4207_vm1, %v2614_v13  ;;  %2637 = vpow2.f32 %v739_v1  ;;  %v3423_v25 = vpop.xlane.xlu0 %622  ;;  %v3429_v56 = vpop.xlane.xlu1 %627  ;;  %v705_v18 = vmul.f32 1.442695, %v648_v41 }
  0xe1   : > { %2345 = vmatprep.subr.mxu1 %v4255_v12  ;;  %4262 = vst [vmem:[#allocation28_spill] sm:$0xff] %v3423_v25  ;;  %4263 = vst [vmem:[#allocation29_spill] sm:$0xff] %v3429_v56  ;;  %2639 = vpow2.f32 %v701_v39  ;;  %v680_v24 = vsub.f32 %v3262_v57, %v3429_v56  ;;  %v677_v5 = vsub.f32 %v3273_v62, %v3423_v25  ;;  %v713_v57 = vmul.f32 1.442695, %v652_v53 }
  0xe2   : > { %2346 = vmatpush3.msra.mxu1 %v4255_v12  ;;  %v2620_v22 = vpop.eup %2619  ;;  %2641 = vpow2.f32 %v699_v40  ;;  %v717_v40 = vmul.f32 1.442695, %v654_v11 }
  0xe3   : > { %2347 = vmatprep.subr.mxu1 %v4255_v12  ;;  %2446 = vmatmul.mubr.msk.f32.gmra.mxu1 %vm4207_vm1, %v2618_v63  ;;  %v2622_v59 = vpop.eup %2621  ;;  %2643 = vpow2.f32 %v757_v20  ;;  %v769_v62 = vmul.f32 1.442695, %v680_v24  ;;  %v763_v35 = vmul.f32 1.442695, %v677_v5  ;;  %v657_v20 = vsub.f32 %v3170_v51, %v3374_v3 }
  0xe4   : > { %2348 = vmatpush3.msra.mxu1 %v4255_v12  ;;  %2448 = vmatprep.mubr.msk.f32.mxu1 %vm4207_vm1, %v2622_v59  ;;  %2645 = vpow2.f32 %v751_v23  ;;  %v3445_v28 = vpop.xlane.xlu0 %632  ;;  %v3451_v1 = vpop.xlane.xlu1 %637  ;;  %v658_v59 = vsub.f32 %v3166_v50, %v3374_v3  ;;  %v661_v23 = vsub.f32 %v3154_v46, %v3376_v42  ;;  %v660_v46 = vsub.f32 %v3158_v47, %v3376_v42 }
  0xe5   : > { %2349 = vmatprep.subr.mxu1 %v4255_v12  ;;  %2647 = vpow2.f32 %v707_v10  ;;  %4264 = vst [vmem:[#allocation30_spill] sm:$0xff] %v3445_v28  ;;  %4265 = vst [vmem:[#allocation31_spill] sm:$0xff] %v3451_v1  ;;  %v686_v29 = vsub.f32 %v3303_v44, %v3451_v1  ;;  %v683_v39 = vsub.f32 %v3306_v45, %v3445_v28 }
  0xe6   : > { %2350 = vmatpush3.msra.mxu1 %v4255_v12  ;;  %v2624_v13 = vpop.eup %2623  ;;  %2649 = vpow2.f32 %v705_v18  ;;  %v725_v10 = vmul.f32 1.442695, %v658_v59  ;;  %v3505_v59 = vadd.s32 128, %v3056_v8 }
  0xe7   : > { %2351 = vmatprep.subr.mxu1 %v4255_v12  ;;  %2449 = vmatmul.mubr.msk.f32.gmra.mxu1 %vm4207_vm1, %v2620_v22  ;;  %v2626_v43 = vpop.eup %2625  ;;  %v711_v22 = vmul.f32 1.442695, %v651_v26  ;;  %2651 = vpow2.f32 %v713_v57  ;;  %v781_v45 = vmul.f32 1.442695, %v686_v29  ;;  %v775_v53 = vmul.f32 1.442695, %v683_v39 }
  0xe8   : > { %2352 = vmatpush3.msra.mxu1 %v4255_v12  ;;  %2451 = vmatprep.mubr.msk.f32.mxu1 %vm4207_vm1, %v2626_v43  ;;  %v2628_v63 = vpop.eup %2627  ;;  %2653 = vpow2.f32 %v769_v62  ;;  %v731_v43 = vmul.f32 1.442695, %v661_v23  ;;  %v664_v26 = vsub.f32 %v3199_v0, %v3389_v49  ;;  %v3482_v2 = vpop.permute.xlu1 %1161  ;;  %v729_v62 = vmul.f32 1.442695, %v660_v46 }
  0xe9   : > { %2353 = vmatprep.subr.mxu1 %v4255_v12  ;;  %v2630_v15 = vpop.eup %2629  ;;  %2655 = vpow2.f32 %v763_v35  ;;  %v667_v35 = vsub.f32 %v3187_v60, %v3393_v48  ;;  %v673_v23 = vsub.f32 %v3222_v27, %v3406_v54  ;;  %v672_v27 = vsub.f32 %v3226_v32, %v3406_v54 }
  0xea   : > { %2354 = vmatpush3.msra.mxu1 %v4255_v12  ;;  %v2632_v30 = vpop.eup %2631  ;;  %2657 = vpow2.f32 %v711_v22  ;;  %vm1209_vm6 = vcmp.eq.s32.totalorder %v3505_v59, %v3482_v2  ;;  %vm1208_vm7 = vcmp.eq.s32.totalorder %v3056_v8, %v3482_v2 }
  0xeb   : > { %2355 = vmatprep.subr.mxu1 %v4255_v12  ;;  %2452 = vmatmul.mubr.msk.f32.gmra.mxu1 %vm4207_vm1, %v2624_v13  ;;  %v2634_v33 = vpop.eup %2633  ;;  %2659 = vpow2.f32 %v719_v52  ;;  %v723_v13 = vmul.f32 1.442695, %v657_v20  ;;  %v670_v52 = vsub.f32 %v3229_v36, %v3402_v16  ;;  %v755_v46 = vmul.f32 1.442695, %v673_v23 }
  0xec   : > { %2356 = vmatpush3.msra.mxu1 %v4255_v12  ;;  %899 = vmatprep.mubr.f32.mxu0 %v2632_v30  ;;  %v2636_v44 = vpop.eup %2635  ;;  %2661 = vpow2.f32 %v717_v40  ;;  %v3496_v39 = vpop.permute.xlu1 %1164  ;;  %v753_v32 = vmul.f32 1.442695, %v672_v27  ;;  %v2744_v27 = vld [vmem:[%s2998_s27 + $0x48] sm:$0xff] }
  0xed   : > { %2357 = vmatprep.subr.mxu1 %v4255_v12  ;;  %900 = vmatmul.mubr.f32.vlgmr.msra.gmra.mxu0 %v2628_v63  ;;  %v2638_v41 = vpop.eup %2637  ;;  %2663 = vpow2.f32 %v781_v45  ;;  %v663_v63 = vsub.f32 %v3206_v7, %v3389_v49  ;;  %v666_v7 = vsub.f32 %v3191_v61, %v3393_v48  ;;  %v669_v45 = vsub.f32 %v3233_v37, %v3402_v16  ;;  %v3511_v20 = vpop.permute.xlu0 %1158 }
  0xee   : > { %2358 = vmatpush3.msra.mxu1 %v4255_v12  ;;  %904 = vmatprep.mubr.f32.mxu0 %v2630_v15  ;;  %v2640_v24 = vpop.eup %2639  ;;  %2665 = vpow2.f32 %v775_v53  ;;  %v737_v15 = vmul.f32 1.442695, %v664_v26  ;;  %vm1206_vm4 = vcmp.eq.s32.totalorder %v3505_v59, %v3511_v20  ;;  %vm1205_vm5 = vcmp.eq.s32.totalorder %v3056_v8, %v3511_v20  ;;  %v4267_v26 = vld [vmem:[#allocation17_spill] sm:$0xff] }
  0xef   : > { %2359 = vmatprep.subr.mxu1 %v4255_v12  ;;  %2454 = vmatprep.mubr.msk.f32.mxu1 %vm4207_vm1, %v2638_v41  ;;  %v2642_v51 = vpop.eup %2641  ;;  %2667 = vpow2.f32 %v725_v10  ;;  %v735_v22 = vmul.f32 1.442695, %v663_v63  ;;  %v741_v41 = vmul.f32 1.442695, %v666_v7  ;;  %v749_v10 = vmul.f32 1.442695, %v670_v52 }
  0xf0   : > { %2360 = vmatpush3.msra.mxu1 %v4255_v12  ;;  %2467 = vmatpush3.msk.msra.mxu0 %vm4204_vm3, %v4255_v12  ;;  %v2644_v5 = vpop.eup %2643  ;;  %2669 = vpow2.f32 %v723_v13  ;;  %v747_v37 = vmul.f32 1.442695, %v669_v45  ;;  %v676_v13 = vsub.f32 %v3265_v58, %v3423_v25  ;;  %vm1212_vm8 = vcmp.eq.s32.totalorder %v3505_v59, %v3496_v39 }
  0xf1   : > { %2361 = vmatprep.subr.mxu1 %v4255_v12  ;;  %2455 = vmatmul.mubr.msk.f32.gmra.mxu1 %vm4207_vm1, %v2636_v44  ;;  %v2646_v18 = vpop.eup %2645  ;;  %2671 = vpow2.f32 %v731_v43  ;;  %v4266_v43 = vld [vmem:[#allocation11_spill] sm:$0xff]  ;;  %vm1211_vm9 = vcmp.eq.s32.totalorder %v3056_v8, %v3496_v39 }
  0xf2   : > { %905 = vmatmul.mubr.f32.gmra.mxu0 %v2634_v33  ;;  %2362 = vmatpush3.msra.mxu1 %v4255_v12  ;;  %v2648_v57 = vpop.eup %2647  ;;  %2673 = vpow2.f32 %v729_v62  ;;  %v743_v33 = vmul.f32 1.442695, %v667_v35  ;;  %v4268_v62 = vld [vmem:[#allocation15_spill] sm:$0xff] }
  0xf3   : > { %909 = vmatprep.mubr.f32.mxu0 %v2640_v24  ;;  %2363 = vmatprep.subr.mxu1 %v4255_v12  ;;  %v2650_v47 = vpop.eup %2649  ;;  %2675 = vpow2.f32 %v737_v15  ;;  %v679_v63 = vsub.f32 %v4268_v62, %v3429_v56  ;;  %v4269_v15 = vld [vmem:[#allocation13_spill] sm:$0xff] }
  0xf4   : > { %2364 = vmatpush3.msra.mxu1 %v4255_v12  ;;  %2457 = vmatprep.mubr.msk.f32.mxu1 %vm4207_vm1, %v2646_v18  ;;  %v2652_v11 = vpop.eup %2651  ;;  %2677 = vpow2.f32 %v735_v22 }
  0xf5   : > { %2365 = vmatprep.subr.mxu1 %v4255_v12  ;;  %2458 = vmatmul.mubr.msk.f32.gmra.mxu1 %vm4207_vm1, %v2644_v5  ;;  %v2654_v29 = vpop.eup %2653  ;;  %2679 = vpow2.f32 %v743_v33  ;;  %v767_v22 = vmul.f32 1.442695, %v679_v63  ;;  %v2746_v63 = vld [vmem:[%s2998_s27 + $0x78] sm:$0xff] }
  0xf6   : > { %910 = vmatmul.mubr.f32.gmra.mxu0 %v2642_v51  ;;  %2366 = vmatpush3.msra.mxu1 %v4255_v12  ;;  %v2656_v30 = vpop.eup %2655  ;;  %v3520_v51 = vpop.permute.xlu1 %1167  ;;  %2681 = vpow2.f32 %v741_v41 }
  0xf7   : > { %914 = vmatprep.mubr.f32.mxu0 %v2648_v57  ;;  %2367 = vmatprep.subr.mxu1 %v4255_v12  ;;  %v2658_v60 = vpop.eup %2657  ;;  %2683 = vpow2.f32 %v749_v10  ;;  %v675_v57 = vsub.f32 %v4267_v26, %v3423_v25  ;;  %vm1215_vm10 = vcmp.eq.s32.totalorder %v3505_v59, %v3520_v51  ;;  %vm1214_vm11 = vcmp.eq.s32.totalorder %v3056_v8, %v3520_v51 }
  0xf8   : > { %2368 = vmatpush3.msra.mxu1 %v4255_v12  ;;  %2460 = vmatprep.mubr.msk.f32.mxu1 %vm4207_vm1, %v2656_v30  ;;  %v2660_v61 = vpop.eup %2659  ;;  %2685 = vpow2.f32 %v747_v37 }
  0xf9   : > { %2369 = vmatprep.subr.mxu1 %v4255_v12  ;;  %2461 = vmatmul.mubr.msk.f32.gmra.mxu1 %vm4207_vm1, %v2654_v29  ;;  %v2662_v44 = vpop.eup %2661  ;;  %2687 = vpow2.f32 %v755_v46  ;;  %v759_v30 = vmul.f32 1.442695, %v675_v57  ;;  %v2745_v57 = vld [vmem:[%s2998_s27 + $0x80] sm:$0xff] }
  0xfa   : > { %915 = vmatmul.mubr.f32.gmra.mxu0 %v2650_v47  ;;  %2370 = vmatpush3.msra.mxu1 %v4255_v12  ;;  %v2664_v40 = vpop.eup %2663  ;;  %2689 = vpow2.f32 %v753_v32  ;;  %v4275_v32 = vld [vmem:[#allocation14_spill] sm:$0xff] }
  0xfb   : > { %919 = vmatprep.mubr.f32.mxu0 %v2652_v11  ;;  %2371 = vmatprep.subr.mxu1 %v4255_v12  ;;  %v2666_v53 = vpop.eup %2665  ;;  %v761_v11 = vmul.f32 1.442695, %v676_v13 }
  0xfc   : > { %2372 = vmatpush3.msra.mxu1 %v4255_v12  ;;  %v2668_v24 = vpop.eup %2667  ;;  %2463 = vmatprep.mubr.msk.f32.mxu1 %vm4207_vm1, %v2666_v53  ;;  %v4273_v53 = vld [vmem:[#allocation18_spill] sm:$0xff] }
  0xfd   : > { %2373 = vmatprep.subr.mxu1 %v4255_v12  ;;  %2464 = vmatmul.mubr.msk.f32.gmra.mxu1 %vm4207_vm1, %v2664_v40  ;;  %v2670_v5 = vpop.eup %2669  ;;  %2691 = vpow2.f32 %v761_v11  ;;  %v4272_v40 = vld [vmem:[#allocation21_spill] sm:$0xff]  ;;  %v685_v23 = vsub.f32 %v4273_v53, %v3451_v1 }
  0xfe   : > { %920 = vmatmul.mubr.f32.gmra.mxu0 %v2658_v60  ;;  %2374 = vmatpush3.msra.mxu1 %v4255_v12  ;;  %v2672_v18 = vpop.eup %2671  ;;  %v4271_v60 = vld [vmem:[#allocation20_spill] sm:$0xff]  ;;  %2693 = vpow2.f32 %v759_v30  ;;  %v681_v41 = vsub.f32 %v4272_v40, %v3445_v28  ;;  %v2751_v40 = vld [vmem:[%s2998_s27 + $0xe0] sm:$0xff]  ;;  %v2753_v53 = vld [vmem:[%s2998_s27 + $0xd8] sm:$0xff] }
  0xff   : > { %924 = vmatprep.mubr.f32.mxu0 %v2660_v61  ;;  %2492 = vmatprep.subr.msk.mxu1 %vm4204_vm3, %v4255_v12  ;;  %v2674_v47 = vpop.eup %2673  ;;  %v682_v33 = vsub.f32 %v4271_v60, %v3445_v28  ;;  %2695 = vpow2.f32 %v767_v22  ;;  %v2749_v22 = vld [vmem:[%s2998_s27 + $0xa8] sm:$0xff] }
 0x100   : > { %2193 = vmatprep.mubr.msk.f32.mxu1 %vm1206_vm4, %v3059_v9  ;;  %v3536_v9 = vpop.permute.xlu1 %1170  ;;  %v2676_v35 = vpop.eup %2675 }
 0x101   : > { %2194 = vmatmul.mubr.msk.f32.vlgmr.msra.gmra.mxu1 %vm1205_vm5, %v4266_v43  ;;  %v2678_v7 = vpop.eup %2677  ;;  %v773_v10 = vmul.f32 1.442695, %v682_v33  ;;  %vm1218_vm12 = vcmp.eq.s32.totalorder %v3505_v59, %v3536_v9  ;;  %vm1217_vm13 = vcmp.eq.s32.totalorder %v3056_v8, %v3536_v9 }
 0x102   : > { %925 = vmatmul.mubr.f32.gmra.mxu0 %v2662_v44  ;;  %2493 = vmatpush3.msk.msra.mxu1 %vm4204_vm3, %v4255_v12  ;;  %v2680_v52 = vpop.eup %2679  ;;  %v2743_v44 = vld [vmem:[%s2998_s27 + $0x30] sm:$0xff] }
 0x103   : > { %929 = vmatprep.mubr.f32.mxu0 %v2668_v24  ;;  %2195 = vmatprep.mubr.msk.f32.mxu1 %vm1209_vm6, %v3084_v19  ;;  %v4270_v19 = vld [vmem:[#allocation16_spill] sm:$0xff]  ;;  %v2682_v45 = vpop.eup %2681 }
 0x104   : > { %v678_v29 = vsub.f32 %v4270_v19, %v3429_v56  ;;  %v3553_v61 = vpop.permute.xlu1 %1173  ;;  %v2684_v24 = vpop.eup %2683 }
 0x105   : > { %2196 = vmatmul.mubr.msk.f32.gmra.mxu1 %vm1208_vm7, %v4269_v15  ;;  %v2686_v13 = vpop.eup %2685  ;;  %vm1221_vm14 = vcmp.eq.s32.totalorder %v3505_v59, %v3553_v61  ;;  %vm1220_vm15 = vcmp.eq.s32.totalorder %v3056_v8, %v3553_v61  ;;  %v2747_v15 = vld [vmem:[%s2998_s27 + $0x90] sm:$0xff] }
 0x106   : > { %930 = vmatmul.mubr.f32.gmra.mxu0 %v2670_v5  ;;  %2197 = vmatprep.mubr.msk.f32.mxu1 %vm1212_vm8, %v3047_v4  ;;  %v765_v4 = vmul.f32 1.442695, %v678_v29  ;;  %v771_v5 = vmul.f32 1.442695, %v681_v41  ;;  %v2688_v43 = vpop.eup %2687  ;;  %v2748_v29 = vld [vmem:[%s2998_s27 + $0xb0] sm:$0xff] }
 0x107   : > { %934 = vmatprep.mubr.f32.mxu0 %v2672_v18  ;;  %v779_v18 = vmul.f32 1.442695, %v685_v23 }
 0x108   : > { %2697 = vpow2.f32 %v765_v4  ;;  %v3572_v46 = vpop.permute.xlu1 %1176  ;;  %v2750_v4 = vld [vmem:[%s2998_s27 + $0xc0] sm:$0xff] }
 0x109   : > { %2198 = vmatmul.mubr.msk.f32.gmra.mxu1 %vm1211_vm9, %v2743_v44  ;;  %2699 = vpow2.f32 %v773_v10  ;;  %vm1224_vm0 = vcmp.eq.s32.totalorder %v3505_v59, %v3572_v46  ;;  %vm1223_vm2 = vcmp.eq.s32.totalorder %v3056_v8, %v3572_v46  ;;  %v3606_v44 = vpop.permute.xlu0 %1185 }
 0x10a   : > { %935 = vmatmul.mubr.f32.gmra.mxu0 %v2674_v47  ;;  %2199 = vmatprep.mubr.msk.f32.mxu1 %vm1215_vm10, %v3069_v14  ;;  %v4274_v14 = vld [vmem:[#allocation19_spill] sm:$0xff]  ;;  %2701 = vpow2.f32 %v771_v5  ;;  %vm1233_vm9 = vcmp.eq.s32.totalorder %v3505_v59, %v3606_v44 }
 0x10b   : > { %939 = vmatprep.mubr.f32.mxu0 %v2676_v35  ;;  %v684_v37 = vsub.f32 %v4274_v14, %v3451_v1  ;;  %2703 = vpow2.f32 %v779_v18  ;;  %v2758_v14 = vld [vmem:[%s2998_s27 + $0x58] sm:$0xff] }
 0x10c   : > { %v3581_v62 = vpop.permute.xlu1 %1179 }
 0x10d   : > { %2200 = vmatmul.mubr.msk.f32.gmra.mxu1 %vm1214_vm11, %v2744_v27  ;;  %v777_v26 = vmul.f32 1.442695, %v684_v37  ;;  %vm1227_vm4 = vcmp.eq.s32.totalorder %v3505_v59, %v3581_v62  ;;  %vm1226_vm5 = vcmp.eq.s32.totalorder %v3056_v8, %v3581_v62  ;;  %vm1232_vm11 = vcmp.eq.s32.totalorder %v3056_v8, %v3606_v44  ;;  %v3633_v10 = vpop.permute.xlu0 %1191  ;;  %v2757_v27 = vld [vmem:[%s2998_s27 + $0x110] sm:$0xff] }
 0x10e   : > { %940 = vmatmul.mubr.f32.gmra.mxu0 %v2678_v7  ;;  %2201 = vmatprep.mubr.msk.f32.mxu1 %vm1218_vm12, %v3132_v34  ;;  %v2690_v34 = vpop.eup %2689 }
 0x10f   : > { %944 = vmatprep.mubr.f32.mxu0 %v2680_v52  ;;  %v2692_v47 = vpop.eup %2691  ;;  %2705 = vpow2.f32 %v777_v26 }
 0x110   : > { %v2694_v11 = vpop.eup %2693  ;;  %v3594_v19 = vpop.permute.xlu1 %1182 }
 0x111   : > { %2202 = vmatmul.mubr.msk.f32.gmra.mxu1 %vm1217_vm13, %v4275_v32  ;;  %v2696_v35 = vpop.eup %2695  ;;  %vm1230_vm6 = vcmp.eq.s32.totalorder %v3505_v59, %v3594_v19  ;;  %vm1229_vm7 = vcmp.eq.s32.totalorder %v3056_v8, %v3594_v19 }
 0x112   : > { %945 = vmatmul.mubr.f32.gmra.mxu0 %v2682_v45  ;;  %2203 = vmatprep.mubr.msk.f32.mxu1 %vm1221_vm14, %v2745_v57  ;;  %v2752_v45 = vld [vmem:[%s2998_s27 + $0x10] sm:$0xff]  ;;  %v2764_v57 = vld [vmem:[%s2998_s27 + $0x140] sm:$0xff] }
 0x113   : > { %949 = vmatprep.mubr.f32.mxu0 %v2684_v24 }
 0x115   : > { %2204 = vmatmul.mubr.msk.f32.gmra.mxu1 %vm1220_vm15, %v2746_v63  ;;  %v2698_v30 = vpop.eup %2697 }
 0x116   : > { %950 = vmatmul.mubr.f32.gmra.mxu0 %v2686_v13  ;;  %2205 = vmatprep.mubr.msk.f32.mxu1 %vm1224_vm0, %v3166_v50  ;;  %v2700_v7 = vpop.eup %2699  ;;  %v3600_v50 = vadd.s32 256, %v3056_v8  ;;  %v2760_v13 = vld [vmem:[%s2998_s27 + $0x108] sm:$0xff] }
 0x117   : > { %954 = vmatprep.mubr.f32.mxu0 %v2688_v43  ;;  %v2702_v33 = vpop.eup %2701  ;;  %v1198_v43 = vpop.permute.xlu0 %1197 }
 0x118   : > { %v2704_v52 = vpop.eup %2703  ;;  %vm1207_vm8 = vcmp.eq.s32.totalorder %v3600_v50, %v3511_v20  ;;  %vm1210_vm10 = vcmp.eq.s32.totalorder %v3600_v50, %v3482_v2  ;;  %vm1213_vm12 = vcmp.eq.s32.totalorder %v3600_v50, %v3496_v39  ;;  %v2754_v2 = vld [vmem:[%s2998_s27 + $0x28] sm:$0xff]  ;;  %vm1216_vm14 = vcmp.eq.s32.totalorder %v3600_v50, %v3520_v51  ;;  %v2755_v39 = vld [vmem:[%s2998_s27 + $0x40] sm:$0xff] }
 0x119   : > { %2206 = vmatmul.mubr.msk.f32.gmra.mxu1 %vm1223_vm2, %v2747_v15  ;;  %v1255_v20 = vsel %vm1207_vm8, %v2752_v45, 0.0  ;;  %v1258_v23 = vsel %vm1210_vm10, %v2754_v2, 0.0  ;;  %v1261_v24 = vsel %vm1213_vm12, %v2755_v39, 0.0  ;;  %vm1219_vm0 = vcmp.eq.s32.totalorder %v3600_v50, %v3536_v9  ;;  %v2759_v9 = vld [vmem:[%s2998_s27 + $0x70] sm:$0xff]  ;;  %v2768_v15 = vld [vmem:[%s2998_s27 + $0xe8] sm:$0xff]  ;;  %v2777_v45 = vld [vmem:[%s2998_s27 + $0x178] sm:$0xff] }
 0x11a   : > { %955 = vmatmul.mubr.f32.gmra.mxu0 %v2690_v34  ;;  %2207 = vmatprep.mubr.msk.f32.mxu1 %vm1227_vm4, %v2748_v29  ;;  %vm1239_vm2 = vcmp.eq.s32.totalorder %v3505_v59, %v3633_v10  ;;  %v1264_v37 = vsel %vm1216_vm14, %v2758_v14, 0.0  ;;  %vm1222_vm4 = vcmp.eq.s32.totalorder %v3600_v50, %v3553_v61  ;;  %v1267_v5 = vsel %vm1219_vm0, %v2759_v9, 0.0  ;;  %v2761_v61 = vld [vmem:[%s2998_s27 + $0x88] sm:$0xff]  ;;  %v2765_v34 = vld [vmem:[%s2998_s27 + $0xb8] sm:$0xff]  ;;  %v2769_v29 = vld [vmem:[%s2998_s27 + $0x150] sm:$0xff] }
 0x11b   : > { %959 = vmatprep.mubr.f32.mxu0 %v2692_v47  ;;  %v1270_v18 = vsel %vm1222_vm4, %v2761_v61, 0.0  ;;  %vm1228_vm8 = vcmp.eq.s32.totalorder %v3600_v50, %v3581_v62  ;;  %vm1231_vm10 = vcmp.eq.s32.totalorder %v3600_v50, %v3594_v19  ;;  %vm1234_vm12 = vcmp.eq.s32.totalorder %v3600_v50, %v3606_v44  ;;  %v2766_v62 = vld [vmem:[%s2998_s27 + $0xd0] sm:$0xff] }
 0x11c   : > { %v2706_v41 = vpop.eup %2705  ;;  %v1276_v47 = vsel %vm1228_vm8, %v2765_v34, 0.0  ;;  %v1279_v63 = vsel %vm1231_vm10, %v2766_v62, 0.0  ;;  %v1282_v19 = vsel %vm1234_vm12, %v2768_v15, 0.0  ;;  %v2781_v34 = vld [vmem:[%s3003_s23 + $0x10] sm:$0xff]  ;;  %v1848_v62 = vld [vmem:[#allocation4] sm:$0xff] }
 0x11d   : > { %2208 = vmatmul.mubr.msk.f32.gmra.mxu1 %vm1226_vm5, %v2749_v22  ;;  %vm1238_vm5 = vcmp.eq.s32.totalorder %v3056_v8, %v3633_v10 }
 0x11e   : > { %960 = vmatmul.mubr.f32.gmra.mxu0 %v2694_v11  ;;  %2209 = vmatprep.mubr.msk.f32.mxu1 %vm1230_vm6, %v3199_v0  ;;  %v3615_v0 = vpop.permute.xlu1 %1188  ;;  %vm1225_vm6 = vcmp.eq.s32.totalorder %v3600_v50, %v3572_v46  ;;  %v2762_v46 = vld [vmem:[%s2998_s27 + $0xa0] sm:$0xff]  ;;  %v2767_v11 = vld [vmem:[%s2998_s27 + $0x138] sm:$0xff] }
 0x11f   : > { %964 = vmatprep.mubr.f32.mxu0 %v2696_v35  ;;  %vm1236_vm13 = vcmp.eq.s32.totalorder %v3505_v59, %v3615_v0  ;;  %vm1235_vm15 = vcmp.eq.s32.totalorder %v3056_v8, %v3615_v0  ;;  %v1273_v32 = vsel %vm1225_vm6, %v2762_v46, 0.0  ;;  %v1204_v35 = vpop.permute.xlu0 %1203 }
 0x120   : > { %vm1251_vm0 = vcmp.eq.s32.totalorder %v3505_v59, %v1204_v35  ;;  %vm1250_vm4 = vcmp.eq.s32.totalorder %v3056_v8, %v1204_v35 }
 0x121   : > { %2210 = vmatmul.mubr.msk.f32.gmra.mxu1 %vm1229_vm7, %v2750_v4  ;;  %v2775_v4 = vld [vmem:[%s2998_s27 + $0x148] sm:$0xff] }
 0x122   : > { %965 = vmatmul.mubr.f32.gmra.mxu0 %v2698_v30  ;;  %2211 = vmatprep.mubr.msk.f32.mxu1 %vm1233_vm9, %v2751_v40  ;;  %v3645_v51 = vpop.permute.xlu1 %1194  ;;  %v2770_v30 = vld [vmem:[%s2998_s27 + $0x170] sm:$0xff]  ;;  %v2776_v40 = vld [vmem:[%s2998_s27 + $0x160] sm:$0xff] }
 0x123   : > { %969 = vmatprep.mubr.f32.mxu0 %v2700_v7  ;;  %vm1242_vm7 = vcmp.eq.s32.totalorder %v3505_v59, %v3645_v51  ;;  %vm1241_vm9 = vcmp.eq.s32.totalorder %v3056_v8, %v3645_v51  ;;  %v2772_v7 = vld [vmem:[%s2998_s27 + $0x100] sm:$0xff]  ;;  %vm1243_vm6 = vcmp.eq.s32.totalorder %v3600_v50, %v3645_v51 }
 0x125   : > { %2212 = vmatmul.mubr.msk.f32.gmra.mxu1 %vm1232_vm11, %v2753_v53  ;;  %vm1245_vm11 = vcmp.eq.s32.totalorder %v3505_v59, %v1198_v43  ;;  %v4276_v53 = vlaneseq }
 0x126   : > { %970 = vmatmul.mubr.f32.gmra.mxu0 %v2702_v33  ;;  %2213 = vmatprep.mubr.msk.f32.mxu1 %vm1236_vm13, %v3229_v36  ;;  %v2756_v36 = vld [vmem:[%s2998_s27 + $0xf0] sm:$0xff]  ;;  %v1201_v26 = vpop.permute.xlu1 %1200  ;;  %vm1244_vm13 = vcmp.eq.s32.totalorder %v3056_v8, %v1198_v43 }
 0x127   : > { %974 = vmatprep.mubr.f32.mxu0 %v2704_v52  ;;  %vm1248_vm14 = vcmp.eq.s32.totalorder %v3505_v59, %v1201_v26  ;;  %v2773_v59 = vld [vmem:[%s2998_s27 + $0x118] sm:$0xff]  ;;  %v2774_v52 = vld [vmem:[%s2998_s27 + $0x130] sm:$0xff]  ;;  %vm1249_vm8 = vcmp.eq.s32.totalorder %v3600_v50, %v1201_v26  ;;  %v3715_v2 = vshrl.u32 %v4276_v53, 7 }
 0x128   : > { %v1291_v44 = vsel %vm1243_vm6, %v2774_v52, 0.0  ;;  %v1853_v53 = vld [vmem:[#allocation4 + $0x28] sm:$0xff] }
 0x129   : > { %2214 = vmatmul.mubr.msk.f32.gmra.mxu1 %vm1235_vm15, %v2756_v36  ;;  %vm1247_vm15 = vcmp.eq.s32.totalorder %v3056_v8, %v1201_v26  ;;  %v1707_v9 = vadd.s32 24, %v3715_v2  ;;  %v1709_v46 = vadd.s32 40, %v3715_v2  ;;  %v1710_v52 = vadd.s32 48, %v3715_v2 }
 0x12a   : > { %975 = vmatmul.mubr.f32.gmra.mxu0 %v2706_v41  ;;  %2215 = vmatprep.mubr.msk.f32.mxu1 %vm1239_vm2, %v2757_v27  ;;  %vm1237_vm2 = vcmp.eq.s32.totalorder %v3600_v50, %v3615_v0  ;;  %v1297_v41 = vsel %vm1249_vm8, %v2776_v40, 0.0  ;;  %v2778_v27 = vld [vmem:[%s3003_s23 + $0x8] sm:$0xff] }
 0x12b   : > { %2468 = vmatprep.mubr.msk.f32.mxu0 %vm4207_vm1, %v1255_v20  ;;  %v1285_v22 = vsel %vm1237_vm2, %v2772_v7, 0.0  ;;  %vm1737_vm10 = vcmp.ne.f32.partialorder %v2778_v27, 0.0  ;;  %vm1738_vm2 = vcmp.ne.f32.partialorder %v2781_v34, 0.0  ;;  %v1711_v7 = vadd.s32 56, %v3715_v2 }
 0x12c   : > { %v1712_v27 = vadd.s32 64, %v3715_v2 }
 0x12d   : > { %2216 = vmatmul.mubr.msk.f32.gmra.mxu1 %vm1238_vm5, %v2760_v13  ;;  %vm1240_vm5 = vcmp.eq.s32.totalorder %v3600_v50, %v3633_v10  ;;  %v3722_v10 = vstv %s2175_s22  ;;  %v1706_v13 = vadd.s32 16, %v3715_v2 }
 0x12e   : > { %2469 = vmatmul.mubr.msk.f32.vlgmr.msra.gmra.mxu0 %vm4207_vm1, %v1258_v23  ;;  %2217 = vmatprep.mubr.msk.f32.mxu1 %vm1242_vm7, %v3265_v58  ;;  %v2763_v58 = vld [vmem:[%s2998_s27 + $0x120] sm:$0xff]  ;;  %v1288_v33 = vsel %vm1240_vm5, %v2773_v59, 0.0  ;;  %vm1246_vm7 = vcmp.eq.s32.totalorder %v3600_v50, %v1198_v43  ;;  %v1720_v14 = vadd.s32 %v3715_v2, %v3722_v10  ;;  %v1723_v43 = vadd.s32 %v1707_v9, %v3722_v10  ;;  %v2785_v9 = vld [vmem:[%s3003_s23 + $0x30] sm:$0xff] }
 0x12f   : > { %2471 = vmatprep.mubr.msk.f32.mxu0 %vm4207_vm1, %v1261_v24  ;;  %v1294_v0 = vsel %vm1246_vm7, %v2775_v4, 0.0  ;;  %v3719_v23 = vld [vmem:[%s2993_s11] sm:$0x3]  ;;  %v4283_v59 = vmov 0  ;;  %v1727_v40 = vadd.s32 %v1711_v7, %v3722_v10 }
 0x130   : > { %v472_v39 = vand.u32 2147483647, %v3719_v23 }
 0x131   : > { %2218 = vmatmul.mubr.msk.f32.gmra.mxu1 %vm1241_vm9, %v2763_v58  ;;  %vm1252_vm9 = vcmp.eq.s32.totalorder %v3600_v50, %v1204_v35  ;;  %v1705_v50 = vadd.s32 8, %v3715_v2 }
 0x132   : > { %2472 = vmatmul.mubr.msk.f32.gmra.mxu0 %vm4207_vm1, %v1264_v37  ;;  %2219 = vmatprep.mubr.msk.f32.mxu1 %vm1245_vm11, %v2764_v57  ;;  %v1300_v20 = vsel %vm1252_vm9, %v2777_v45, 0.0  ;;  %v473_v36 = vsub.f32 0.0, %v472_v39  ;;  %v2779_v37 = vld [vmem:[%s3003_s23] sm:$0xff]  ;;  %v1722_v57 = vadd.s32 %v1706_v13, %v3722_v10  ;;  %v4286_v45 = vmov 0  ;;  %v2784_v39 = vld [vmem:[%s3003_s23 + $0x38] sm:$0xff] }
 0x133   : > { %2474 = vmatprep.mubr.msk.f32.mxu0 %vm4207_vm1, %v1267_v5  ;;  %v1721_v24 = vadd.s32 %v1705_v50, %v3722_v10  ;;  %vm1736_vm12 = vcmp.ne.f32.partialorder %v2779_v37, 0.0  ;;  %v2780_v5 = vld [vmem:[%s3003_s23 + $0x18] sm:$0xff] }
 0x134   : > { %v474_v51 = vmul.f32 1.442695, %v473_v36  ;;  %vm1754_vm6 = vcmp.lt.s32.totalorder %v1722_v57, 500  ;;  %v1855_v57 = vld [vmem:[#allocation4 + $0x38] sm:$0xff] }
 0x135   : > { %2220 = vmatmul.mubr.msk.f32.gmra.mxu1 %vm1244_vm13, %v2767_v11  ;;  %vm1753_vm11 = vcmp.lt.s32.totalorder %v1721_v24, 500  ;;  %vm1739_vm13 = vcmp.ne.f32.partialorder %v2780_v5, 0.0  ;;  %v1725_v11 = vadd.s32 %v1709_v46, %v3722_v10  ;;  %vm3766_vm9 = vmand %vm1738_vm2, %vm1754_vm6  ;;  %v1713_v24 = vadd.s32 72, %v3715_v2 }
 0x136   : > { %2475 = vmatmul.mubr.msk.f32.gmra.mxu0 %vm4207_vm1, %v1270_v18  ;;  %2221 = vmatprep.mubr.msk.f32.mxu1 %vm1248_vm14, %v4271_v60  ;;  %v2771_v60 = vld [vmem:[%s2998_s27 + $0x168] sm:$0xff]  ;;  %2707 = vpow2.f32 %v474_v51  ;;  %vm3733_vm14 = vmand %vm1737_vm10, %vm1753_vm11  ;;  %v4284_v59 = vsel %vm3766_vm9, 4294967295, %v4283_v59  ;;  %v4289_v51 = vmov 0  ;;  %v1728_v46 = vadd.s32 %v1712_v27, %v3722_v10  ;;  %v1859_v27 = vld [vmem:[#allocation4 + $0x58] sm:$0xff] }
 0x137   : > { %2477 = vmatprep.mubr.msk.f32.mxu0 %vm4207_vm1, %v1273_v32  ;;  %v1849_v18 = vld [vmem:[#allocation4 + $0x8] sm:$0xff]  ;;  %v2891_v32 = vmov 0.0   ;;  %vm1757_vm8 = vcmp.lt.s32.totalorder %v1725_v11, 500  ;;  %4285 = vst [vmem:[#allocation11_spill] sm:$0xff] %v4284_v59  ;;  %v1729_v5 = vadd.s32 %v1713_v24, %v3722_v10  ;;  %v1854_v11 = vld [vmem:[#allocation4 + $0x30] sm:$0xff] }
 0x138   : > { %v1865_v58 = vsel %vm3733_vm14, 1.0, %v2891_v32  ;;  %v1866_v4 = vsel %vm3766_vm9, 1.0, %v2891_v32 }
 0x139   : > { %2222 = vmatmul.mubr.msk.f32.gmra.mxu1 %vm1247_vm15, %v2769_v29  ;;  %vm1752_vm15 = vcmp.lt.s32.totalorder %v1720_v14, 500  ;;  %v1851_v29 = vld [vmem:[#allocation4 + $0x18] sm:$0xff]  ;;  %v1852_v14 = vld [vmem:[#allocation4 + $0x20] sm:$0xff] }
 0x13a   : > { %2478 = vmatmul.mubr.msk.f32.gmra.mxu0 %vm4207_vm1, %v1276_v47  ;;  %2223 = vmatprep.mubr.msk.f32.mxu1 %vm1251_vm0, %v2770_v30  ;;  %vm3742_vm0 = vmand %vm1736_vm12, %vm1752_vm15  ;;  %v1881_v47 = vadd.f32 %v1865_v58, %v1849_v18  ;;  %vm1759_vm15 = vcmp.lt.s32.totalorder %v1727_v40, 500  ;;  %v1715_v40 = vadd.s32 88, %v3715_v2 }
 0x13b   : > { %2480 = vmatprep.mubr.msk.f32.mxu0 %vm4207_vm1, %v1279_v63  ;;  %v1864_v63 = vsel %vm3742_vm0, 1.0, %v2891_v32 }
 0x13c   : > { %v1880_v35 = vadd.f32 %v1864_v63, %v1848_v62  ;;  %1897 = vst.msk [vmem:[#allocation4 + $0x8] sm:$0xff] %vm4207_vm1, %v1881_v47  ;;  %v2786_v47 = vld [vmem:[%s3003_s23 + $0x48] sm:$0xff]  ;;  %v4295_v63 = vmov 0 }
 0x13d   : > { %2224 = vmatmul.mubr.msk.f32.gmra.mxu1 %vm1250_vm4, %v2771_v60  ;;  %vm1755_vm4 = vcmp.lt.s32.totalorder %v1723_v43, 500  ;;  %v2782_v60 = vld [vmem:[%s3003_s23 + $0x28] sm:$0xff]  ;;  %v4292_v43 = vmov 0 }
 0x13e   : > { %2481 = vmatmul.mubr.msk.f32.gmra.mxu0 %vm4207_vm1, %v1282_v19  ;;  %2483 = vmatprep.mubr.msk.f32.mxu1 %vm4207_vm1, %v1285_v22  ;;  %vm3753_vm5 = vmand %vm1739_vm13, %vm1755_vm4  ;;  %v1708_v19 = vadd.s32 32, %v3715_v2  ;;  %vm1741_vm7 = vcmp.ne.f32.partialorder %v2782_v60, 0.0  ;;  %1896 = vst.msk [vmem:[#allocation4] sm:$0xff] %vm4207_vm1, %v1880_v35  ;;  %vm1743_vm13 = vcmp.ne.f32.partialorder %v2784_v39, 0.0  ;;  %vm1742_vm4 = vcmp.ne.f32.partialorder %v2785_v9, 0.0  ;;  %v1857_v60 = vld [vmem:[#allocation4 + $0x48] sm:$0xff] }
 0x13f   : > { %v1867_v30 = vsel %vm3753_vm5, 1.0, %v2891_v32  ;;  %vm3779_vm11 = vmand %vm1741_vm7, %vm1757_vm8  ;;  %vm1745_vm8 = vcmp.ne.f32.partialorder %v2786_v47, 0.0  ;;  %v2892_v39 = vmov 1966171168  }
 0x140   : > { %v1883_v22 = vadd.f32 %v1867_v30, %v1851_v29  ;;  %v4287_v45 = vsel %vm3779_vm11, 4294967295, %v4286_v45  ;;  %v1869_v50 = vsel %vm3779_vm11, 1.0, %v2891_v32  ;;  %vm3804_vm7 = vmand %vm1743_vm13, %vm1759_vm15  ;;  %vm1760_vm15 = vcmp.lt.s32.totalorder %v1728_v46, 500 }
 0x141   : > { %2484 = vmatmul.mubr.msk.f32.vlgmr.msra.gmra.mxu1 %vm4207_vm1, %v1288_v33  ;;  %v1724_v33 = vadd.s32 %v1708_v19, %v3722_v10  ;;  %4288 = vst [vmem:[#allocation17_spill] sm:$0xff] %v4287_v45  ;;  %v1885_v36 = vadd.f32 %v1869_v50, %v1853_v53  ;;  %v4293_v43 = vsel %vm3804_vm7, 4294967295, %v4292_v43  ;;  %v1871_v34 = vsel %vm3804_vm7, 1.0, %v2891_v32  ;;  %v2787_v19 = vld [vmem:[%s3003_s23 + $0x40] sm:$0xff]  ;;  %v2788_v50 = vld [vmem:[%s3003_s23 + $0x58] sm:$0xff] }
 0x142   : > { %2486 = vmatprep.mubr.msk.f32.mxu1 %vm4207_vm1, %v1291_v44  ;;  %v1850_v44 = vld [vmem:[#allocation4 + $0x10] sm:$0xff]  ;;  %1899 = vst.msk [vmem:[#allocation4 + $0x18] sm:$0xff] %vm4207_vm1, %v1883_v22  ;;  %4294 = vst [vmem:[#allocation13_spill] sm:$0xff] %v4293_v43  ;;  %v1887_v62 = vadd.f32 %v1871_v34, %v1855_v57  ;;  %vm1744_vm13 = vcmp.ne.f32.partialorder %v2787_v19, 0.0  ;;  %v4298_v30 = vmov 0  ;;  %v1731_v53 = vadd.s32 %v1715_v40, %v3722_v10 }
 0x143   : > { %vm1756_vm12 = vcmp.lt.s32.totalorder %v1724_v33, 500  ;;  %v2708_v13 = vpop.eup %2707  ;;  %1901 = vst.msk [vmem:[#allocation4 + $0x28] sm:$0xff] %vm4207_vm1, %v1885_v36  ;;  %v4301_v33 = vmov 0  ;;  %v488_v24 = vunpack.c.l.s4 %v2892_v39  ;;  %v4304_v36 = vmov 0 }
 0x144   : > { %v476_v58 = vadd.f32 1.0, %v2708_v13  ;;  %1903 = vst.msk [vmem:[#allocation4 + $0x38] sm:$0xff] %vm4207_vm1, %v1887_v62  ;;  %v1717_v57 = vadd.s32 104, %v3715_v2  ;;  %v1858_v62 = vld [vmem:[#allocation4 + $0x50] sm:$0xff]  ;;  %v1716_v19 = vadd.s32 96, %v3715_v2 }
 0x145   : > { %2487 = vmatmul.mubr.msk.f32.gmra.mxu1 %vm4207_vm1, %v1294_v0  ;;  %v2783_v0 = vld [vmem:[%s3003_s23 + $0x20] sm:$0xff]  ;;  %v489_v47 = vunpack.c.0.s8 %v488_v24  ;;  %v1718_v24 = vadd.s32 112, %v3715_v2 }
 0x146   : > { %2489 = vmatprep.mubr.msk.f32.mxu1 %vm4207_vm1, %v1297_v41  ;;  %vm1740_vm10 = vcmp.ne.f32.partialorder %v2783_v0, 0.0  ;;  %v1882_v41 = vadd.f32 %v1866_v4, %v1850_v44  ;;  %2709 = vlog2.f32 %v476_v58  ;;  %v1856_v44 = vld [vmem:[#allocation4 + $0x40] sm:$0xff]  ;;  %v2789_v58 = vld [vmem:[%s3003_s23 + $0x50] sm:$0xff] }
 0x147   : > { %vm3791_vm2 = vmand %vm1740_vm10, %vm1756_vm12  ;;  %vm1761_vm10 = vcmp.lt.s32.totalorder %v1729_v5, 500 }
 0x148   : > { %1898 = vst.msk [vmem:[#allocation4 + $0x10] sm:$0xff] %vm4207_vm1, %v1882_v41  ;;  %v4290_v51 = vsel %vm3791_vm2, 4294967295, %v4289_v51  ;;  %v1868_v37 = vsel %vm3791_vm2, 1.0, %v2891_v32  ;;  %vm3825_vm3 = vmand %vm1745_vm8, %vm1761_vm10  ;;  %v466_v41 = vmax.f32 %v3719_v23, 0.0  ;;  %vm1763_vm8 = vcmp.lt.s32.totalorder %v1731_v53, 500 }
 0x149   : > { %2490 = vmatmul.mubr.msk.f32.gmra.mxu1 %vm4207_vm1, %v1300_v20  ;;  %v1726_v20 = vadd.s32 %v1710_v52, %v3722_v10  ;;  %4291 = vst [vmem:[#allocation15_spill] sm:$0xff] %v4290_v51  ;;  %v1884_v18 = vadd.f32 %v1868_v37, %v1852_v14  ;;  %v4299_v30 = vsel %vm3825_vm3, 4294967295, %v4298_v30  ;;  %v1873_v7 = vsel %vm3825_vm3, 1.0, %v2891_v32 }
 0x14a   : > { %4300 = vst [vmem:[#allocation20_spill] sm:$0xff] %v4299_v30  ;;  %v1889_v22 = vadd.f32 %v1873_v7, %v1857_v60  ;;  %v468_v52 = vrot.slane %v3719_v23, 1  ;;  %v1714_v14 = vadd.s32 80, %v3715_v2  ;;  %v462_v37 = vadd.s32 %v3722_v10, %v3056_v8 }
 0x14b   : > { %vm1758_vm6 = vcmp.lt.s32.totalorder %v1726_v20, 500  ;;  %1900 = vst.msk [vmem:[#allocation4 + $0x20] sm:$0xff] %vm4207_vm1, %v1884_v18  ;;  %v4308_v7 = vmov 0 }
 0x14c   : > { %vm3816_vm12 = vmand %vm1742_vm4, %vm1758_vm6  ;;  %1905 = vst.msk [vmem:[#allocation4 + $0x48] sm:$0xff] %vm4207_vm1, %v1889_v22  ;;  %v470_v20 = vmul.f32 %v468_v52, %v3719_v23  ;;  %vm1747_vm6 = vcmp.ne.f32.partialorder %v2788_v50, 0.0  ;;  %v1730_v46 = vadd.s32 %v1714_v14, %v3722_v10  ;;  %v2791_v22 = vld [vmem:[%s3003_s23 + $0x60] sm:$0xff] }
 0x14d   : > { %v4296_v63 = vsel %vm3816_vm12, 4294967295, %v4295_v63  ;;  %v1870_v35 = vsel %vm3816_vm12, 1.0, %v2891_v32  ;;  %vm3833_vm4 = vmand %vm1744_vm13, %vm1760_vm15  ;;  %vm1746_vm15 = vcmp.ne.f32.partialorder %v2789_v58, 0.0  ;;  %v1860_v50 = vld [vmem:[#allocation4 + $0x60] sm:$0xff] }
 0x14e   : > { %4297 = vst [vmem:[#allocation16_spill] sm:$0xff] %v4296_v63  ;;  %v1886_v29 = vadd.f32 %v1870_v35, %v1854_v11  ;;  %v4302_v33 = vsel %vm3833_vm4, 4294967295, %v4301_v33  ;;  %v1872_v4 = vsel %vm3833_vm4, 1.0, %v2891_v32  ;;  %vm3848_vm10 = vmand %vm1747_vm6, %vm1763_vm8  ;;  %v471_v9 = vsub.f32 %v466_v41, %v470_v20  ;;  %v2790_v35 = vld [vmem:[%s3003_s23 + $0x68] sm:$0xff]  ;;  %v2792_v20 = vld [vmem:[%s3003_s23 + $0x78] sm:$0xff] }
 0x14f   : > { %4303 = vst [vmem:[#allocation21_spill] sm:$0xff] %v4302_v33  ;;  %v1888_v0 = vadd.f32 %v1872_v4, %v1856_v44  ;;  %v4305_v36 = vsel %vm3848_vm10, 4294967295, %v4304_v36  ;;  %v1875_v5 = vsel %vm3848_vm10, 1.0, %v2891_v32  ;;  %vm1762_vm6 = vcmp.lt.s32.totalorder %v1730_v46, 500  ;;  %v1861_v44 = vld [vmem:[#allocation4 + $0x68] sm:$0xff] }
 0x150   : > { %1902 = vst.msk [vmem:[#allocation4 + $0x30] sm:$0xff] %vm4207_vm1, %v1886_v29  ;;  %4306 = vst [vmem:[#allocation18_spill] sm:$0xff] %v4305_v36  ;;  %v1891_v18 = vadd.f32 %v1875_v5, %v1859_v27  ;;  %v1733_v11 = vadd.s32 %v1717_v57, %v3722_v10  ;;  %vm4307_vm10 = vcmp.ne.f32.partialorder %v3719_v23, 0.0  ;;  %v1732_v4 = vadd.s32 %v1716_v19, %v3722_v10  ;;  %v2793_v46 = vld [vmem:[%s3003_s23 + $0x70] sm:$0xff] }
 0x151   : > { %1904 = vst.msk [vmem:[#allocation4 + $0x40] sm:$0xff] %vm4207_vm1, %v1888_v0  ;;  %v465_v29 = vsel %vm4307_vm10, 30.0, %v4255_v12  ;;  %vm3869_vm4 = vmand %vm1746_vm15, %vm1762_vm6  ;;  %v1719_v0 = vadd.s32 120, %v3715_v2  ;;  %v492_v12 = vsub.s32 %v489_v47, %v3715_v2  ;;  %vm4311_vm10 = vcmp.ne.f32.partialorder %v2790_v35, 0.0 }
 0x152   : > { %1907 = vst.msk [vmem:[#allocation4 + $0x58] sm:$0xff] %vm4207_vm1, %v1891_v18  ;;  %v4309_v7 = vsel %vm3869_vm4, 4294967295, %v4308_v7  ;;  %v1874_v52 = vsel %vm3869_vm4, 1.0, %v2891_v32  ;;  %vm1765_vm8 = vcmp.lt.s32.totalorder %v1733_v11, 500  ;;  %v4312_v41 = vmov 0 }
 0x153   : > { %v2710_v13 = vpop.eup %2709  ;;  %4310 = vst [vmem:[#allocation19_spill] sm:$0xff] %v4309_v7  ;;  %v1890_v23 = vadd.f32 %v1874_v52, %v1858_v62  ;;  %vm3881_vm15 = vmand %vm4311_vm10, %vm1765_vm8  ;;  %vm1764_vm13 = vcmp.lt.s32.totalorder %v1732_v4, 500  ;;  %v1735_v39 = vadd.s32 %v1719_v0, %v3722_v10  ;;  %vm4315_vm1 = vcmask 7168   ;;  %v1862_v62 = vld [vmem:[#allocation4 + $0x70] sm:$0xff] }
 0x154   : > { %v478_v34 = vmul.f32 0.6931472, %v2710_v13  ;;  %v4313_v41 = vsel %vm3881_vm15, 4294967295, %v4312_v41  ;;  %v1877_v53 = vsel %vm3881_vm15, 1.0, %v2891_v32  ;;  %vm4316_vm8 = vcmp.ne.f32.partialorder %v2791_v22, 0.0  ;;  %v1863_v13 = vld [vmem:[#allocation4 + $0x78] sm:$0xff]  ;;  %vm4321_vm3 = vmmov %vm4315_vm1 }
 0x155   : > { %4314 = vst [vmem:[#allocation14_spill] sm:$0xff] %v4313_v41  ;;  %1906 = vst.msk [vmem:[#allocation4 + $0x50] sm:$0xff] %vm4315_vm1, %v1890_v23  ;;  %v1893_v14 = vadd.f32 %v1877_v53, %v1861_v44  ;;  %vm1767_vm6 = vcmp.lt.s32.totalorder %v1735_v39, 500  ;;  %v1734_v18 = vadd.s32 %v1718_v24, %v3722_v10  ;;  %vm1750_vm15 = vcmp.ne.f32.partialorder %v2793_v46, 0.0 }
 0x156   : > { %v479_v60 = vadd.f32 %v478_v34, %v471_v9  ;;  %vm3893_vm10 = vmand %vm4316_vm8, %vm1764_vm13  ;;  %v4317_v9 = vmov 0  ;;  %vm4320_vm4 = vcmp.lt.s32.totalorder %v462_v37, 500  ;;  %vm4322_vm1 = vcmp.ne.f32.partialorder %v2792_v20, 0.0 }
 0x157   : > { %v4318_v9 = vsel %vm3893_vm10, 4294967295, %v4317_v9  ;;  %v1876_v5 = vsel %vm3893_vm10, 1.0, %v2891_v32  ;;  %1909 = vst.msk [vmem:[#allocation4 + $0x68] sm:$0xff] %vm4321_vm3, %v1893_v14  ;;  %vm3905_vm13 = vmand %vm4322_vm1, %vm1767_vm6  ;;  %v4323_v57 = vmov 0  ;;  %vm1766_vm8 = vcmp.lt.s32.totalorder %v1734_v18, 500 }
 0x158   : > { %v482_v40 = vrot.slane %v479_v60, 7  ;;  %4319 = vst [vmem:[#allocation32_spill] sm:$0xff] %v4318_v9  ;;  %v1892_v58 = vadd.f32 %v1876_v5, %v1860_v50  ;;  %v4324_v57 = vsel %vm3905_vm13, 4294967295, %v4323_v57  ;;  %v1879_v47 = vsel %vm3905_vm13, 1.0, %v2891_v32  ;;  %vm4326_vm10 = vmmov %vm4321_vm3 }
 0x159   : > { %4325 = vst [vmem:[#allocation33_spill] sm:$0xff] %v4324_v57  ;;  %v1895_v10 = vadd.f32 %v1879_v47, %v1863_v13  ;;  %vm3913_vm12 = vmand %vm1750_vm15, %vm1766_vm8  ;;  %v4327_v37 = vmov 0 }
 0x15a   : > { %v484_v27 = vmul.f32 %v482_v40, %v465_v29  ;;  %1908 = vst.msk [vmem:[#allocation4 + $0x60] sm:$0xff] %vm4326_vm10, %v1892_v58  ;;  %v4328_v37 = vsel %vm3913_vm12, 4294967295, %v4327_v37  ;;  %v1878_v19 = vsel %vm3913_vm12, 1.0, %v2891_v32  ;;  %v480_v29 = vld [vmem:[#allocation2] sm:$0x1] }
 0x15b   : > { %4329 = vst [vmem:[#allocation34_spill] sm:$0xff] %v4328_v37  ;;  %1911 = vst.msk [vmem:[#allocation4 + $0x78] sm:$0xff] %vm4321_vm3, %v1895_v10  ;;  %v1894_v60 = vadd.f32 %v1878_v19, %v1862_v62 }
 0x15c   : > { %v485_v2 = vsel %vm4320_vm4, %v484_v27, 0.0  ;;  %vm4330_vm4 = vmmov %vm4321_vm3 }
 0x15d   : > { %v493_v34 = vrot.slane %v485_v2, %v492_v12  ;;  %1910 = vst.msk [vmem:[#allocation4 + $0x70] sm:$0xff] %vm4330_vm4, %v1894_v60 }
 0x15f   : > { %v494_v35 = vcombine.high %v493_v34, %v493_v34 }
 0x161   : > { %v501_v52 = vrot.slane %v494_v35, %v492_v12 }
 0x163   : > { %v503_v4 = vadd.f32 %v501_v52, %v480_v29 }
 0x165   : > { %504 = vst [vmem:[#allocation2] sm:$0x1] %v503_v4 }
 0x19f   : > { %v2444_v11 = vpop.f32.mrf.mxu1 }
 0x1a1   : > { %v1046_v22 = vpop.f32.mrf.mxu1 }
 0x1a3   : > { %v2447_v44 = vpop.f32.mrf.mxu1 }
 0x1a5   : > { %v1056_v0 = vpop.f32.mrf.mxu1 }
 0x1a7   : > { %v2450_v40 = vpop.f32.mrf.mxu1 }
 0x1a9   : > { %v1066_v23 = vpop.f32.mrf.mxu1 }
 0x1ab   : > { %v3922_v20 = vpop.f32.mrf.mxu1 }
 0x1ad   : > { %v3924_v53 = vpop.f32.mrf.mxu1  ;;  %v2278_v50 = vpop.f32.mrf.mxu0 }
 0x1af   : > { %v2279_v32 = vpop.f32.mrf.mxu0 }
 0x1b0   : > { %v2280_v25 = vadd.f32 %v2279_v32, %v2278_v50 }
 0x1b1   : > { %v3926_v39 = vpop.f32.mrf.mxu1 }
 0x1b2   : > { %v2281_v24 = vpop.f32.mrf.mxu0  ;;  %v1047_v63 = vadd.f32 %v2280_v25, %v1046_v22 }
 0x1b3   : > { %v3928_v27 = vpop.f32.mrf.mxu1 }
 0x1b4   : > { %v2282_v12 = vpop.f32.mrf.mxu0  ;;  %2711 = vlog2.f32 %v1047_v63 }
 0x1b5   : > { %v3930_v5 = vpop.f32.mrf.mxu1  ;;  %v2283_v56 = vadd.f32 %v2282_v12, %v2281_v24 }
 0x1b6   : > { %v2284_v14 = vpop.f32.mrf.mxu0 }
 0x1b7   : > { %v3932_v18 = vpop.f32.mrf.mxu1  ;;  %v1052_v51 = vadd.f32 %v2444_v11, %v2283_v56 }
 0x1b8   : > { %v2285_v13 = vpop.f32.mrf.mxu0 }
 0x1b9   : > { %v3934_v58 = vpop.f32.mrf.mxu1  ;;  %v2286_v54 = vadd.f32 %v2285_v13, %v2284_v14  ;;  %2713 = vlog2.f32 %v1052_v51 }
 0x1ba   : > { %v2287_v46 = vpop.f32.mrf.mxu0 }
 0x1bb   : > { %v3936_v47 = vpop.f32.mrf.mxu1  ;;  %v1057_v42 = vadd.f32 %v2286_v54, %v1056_v0 }
 0x1bc   : > { %v2288_v2 = vpop.f32.mrf.mxu0 }
 0x1bd   : > { %v3938_v35 = vpop.f32.mrf.mxu1  ;;  %v2289_v30 = vadd.f32 %v2288_v2, %v2287_v46  ;;  %2715 = vlog2.f32 %v1057_v42 }
 0x1be   : > { %v2290_v34 = vpop.f32.mrf.mxu0 }
 0x1bf   : > { %v3940_v29 = vpop.f32.mrf.mxu1  ;;  %v1062_v50 = vadd.f32 %v2447_v44, %v2289_v30 }
 0x1c0   : > { %v2291_v62 = vpop.f32.mrf.mxu0 }
 0x1c1   : > { %v3942_v52 = vpop.f32.mrf.mxu1  ;;  %v2292_v43 = vadd.f32 %v2291_v62, %v2290_v34  ;;  %2717 = vlog2.f32 %v1062_v50 }
 0x1c2   : > { %v2293_v10 = vpop.f32.mrf.mxu0 }
 0x1c3   : > { %v3944_v8 = vpop.f32.mrf.mxu1  ;;  %v1067_v24 = vadd.f32 %v2292_v43, %v1066_v23 }
 0x1c4   : > { %v2294_v19 = vpop.f32.mrf.mxu0 }
 0x1c5   : > { %v3946_v57 = vpop.f32.mrf.mxu1  ;;  %v2295_v3 = vadd.f32 %v2294_v19, %v2293_v10  ;;  %2719 = vlog2.f32 %v1067_v24 }
 0x1c6   : > { %v2296_v60 = vpop.f32.mrf.mxu0 }
 0x1c7   : > { %v3948_v9 = vpop.f32.mrf.mxu1  ;;  %v1072_v14 = vadd.f32 %v2450_v40, %v2295_v3 }
 0x1c8   : > { %v2297_v4 = vpop.f32.mrf.mxu0 }
 0x1c9   : > { %v3950_v1 = vpop.f32.mrf.mxu1  ;;  %2721 = vlog2.f32 %v1072_v14  ;;  %v2298_v63 = vadd.f32 %v2297_v4, %v2296_v60 }
 0x1ca   : > { %v2299_v37 = vpop.f32.mrf.mxu0 }
 0x1cb   : > { %v3952_v36 = vpop.f32.mrf.mxu1  ;;  %v1077_v40 = vadd.f32 %v2298_v63, %v3924_v53 }
 0x1cc   : > { %v2300_v28 = vpop.f32.mrf.mxu0 }
 0x1cd   : > { %v3954_v33 = vpop.f32.mrf.mxu1  ;;  %v2301_v54 = vadd.f32 %v2300_v28, %v2299_v37  ;;  %v2712_v28 = vpop.eup %2711 }
 0x1ce   : > { %v2302_v41 = vpop.f32.mrf.mxu0  ;;  %v2714_v62 = vpop.eup %2713  ;;  %v1640_v50 = vmul.f32 0.6931472, %v2712_v28  ;;  %v2377_v28 = vadd.f32 %v3944_v8, %v3942_v52 }
 0x1cf   : > { %v3956_v48 = vpop.f32.mrf.mxu1  ;;  %v1082_v3 = vadd.f32 %v3922_v20, %v2301_v54  ;;  %v2716_v19 = vpop.eup %2715  ;;  %v1642_v24 = vmul.f32 0.6931472, %v2714_v62 }
 0x1d0   : > { %v2303_v7 = vpop.f32.mrf.mxu0  ;;  %v2718_v20 = vpop.eup %2717  ;;  %v2386_v8 = vadd.f32 %v3956_v48, %v3954_v33  ;;  %v1784_v33 = vld [vmem:[#allocation3] sm:$0xff] }
 0x1d1   : > { %v3958_v59 = vpop.f32.mrf.mxu1  ;;  %v2304_v23 = vadd.f32 %v2303_v7, %v2302_v41  ;;  %2723 = vlog2.f32 %v1082_v3  ;;  %v1646_v63 = vmul.f32 0.6931472, %v2718_v20  ;;  %v1644_v3 = vmul.f32 0.6931472, %v2716_v19 }
 0x1d2   : > { %v2305_v16 = vpop.f32.mrf.mxu0  ;;  %2725 = vlog2.f32 %v1077_v40  ;;  %v2720_v7 = vpop.eup %2719 }
 0x1d3   : > { %v3960_v12 = vpop.f32.mrf.mxu1 }
 0x1d4   : > { %v2306_v49 = vpop.f32.mrf.mxu0 }
 0x1d5   : > { %v3962_v25 = vpop.f32.mrf.mxu1  ;;  %v2307_v51 = vadd.f32 %v2306_v49, %v2305_v16  ;;  %v1087_v49 = vadd.f32 %v2304_v23, %v3928_v27  ;;  %v2380_v27 = vadd.f32 %v3948_v9, %v3946_v57 }
 0x1d6   : > { %v2308_v45 = vpop.f32.mrf.mxu0  ;;  %v2722_v4 = vpop.eup %2721 }
 0x1d7   : > { %v3964_v56 = vpop.f32.mrf.mxu1  ;;  %v1092_v37 = vadd.f32 %v3926_v39, %v2307_v51 }
 0x1d8   : > { %v2309_v32 = vpop.f32.mrf.mxu0 }
 0x1d9   : > { %v3966_v30 = vpop.f32.mrf.mxu1  ;;  %2727 = vlog2.f32 %v1092_v37  ;;  %v2310_v41 = vadd.f32 %v2309_v32, %v2308_v45  ;;  %v1650_v32 = vmul.f32 0.6931472, %v2722_v4  ;;  %v1648_v37 = vmul.f32 0.6931472, %v2720_v7 }
 0x1da   : > { %v2311_v13 = vpop.f32.mrf.mxu0  ;;  %2729 = vlog2.f32 %v1087_v49 }
 0x1db   : > { %v3968_v44 = vpop.f32.mrf.mxu1  ;;  %v1097_v40 = vadd.f32 %v2310_v41, %v3932_v18  ;;  %v1674_v18 = vadd.f32 %v1646_v63, %v3358_v55  ;;  %v4007_v55 = vadd.f32 %v1648_v37, %v3366_v17  ;;  %v2392_v17 = vadd.f32 %v3964_v56, %v3962_v25 }
 0x1dc   : > { %v2312_v22 = vpop.f32.mrf.mxu0 }
 0x1dd   : > { %v3971_v0 = vpop.f32.mrf.mxu1  ;;  %v2313_v14 = vadd.f32 %v2312_v22, %v2311_v13  ;;  %v1672_v13 = vadd.f32 %v1642_v24, %v3356_v38  ;;  %v1671_v22 = vadd.f32 %v1640_v50, %v3352_v21  ;;  %v1785_v38 = vld [vmem:[#allocation3 + $0x8] sm:$0xff]  ;;  %2731 = vlog2.f32 %v1097_v40  ;;  %v1786_v40 = vld [vmem:[#allocation3 + $0x10] sm:$0xff] }
 0x1de   : > { %v2314_v11 = vpop.f32.mrf.mxu0 }
 0x1df   : > { %v3974_v2 = vpop.f32.mrf.mxu1  ;;  %v1102_v9 = vadd.f32 %v3930_v5, %v2313_v14  ;;  %v1787_v14 = vld [vmem:[#allocation3 + $0x18] sm:$0xff] }
 0x1e0   : > { %v2315_v43 = vpop.f32.mrf.mxu0 }
 0x1e1   : > { %v3977_v10 = vpop.f32.mrf.mxu1  ;;  %v2316_v57 = vadd.f32 %v2315_v43, %v2314_v11  ;;  %v1676_v43 = vadd.f32 %v1650_v32, %v3368_v6  ;;  %2733 = vlog2.f32 %v1102_v9 }
 0x1e2   : > { %v2317_v42 = vpop.f32.mrf.mxu0 }
 0x1e3   : > { %v3980_v60 = vpop.f32.mrf.mxu1  ;;  %v1107_v4 = vadd.f32 %v2316_v57, %v3936_v47 }
 0x1e4   : > { %v2318_v46 = vpop.f32.mrf.mxu0 }
 0x1e5   : > { %v3982_v39 = vpop.f32.mrf.mxu1  ;;  %v2319_v23 = vadd.f32 %v2318_v46, %v2317_v42  ;;  %v1673_v42 = vadd.f32 %v1644_v3, %v3350_v31  ;;  %v2383_v46 = vadd.f32 %v3952_v36, %v3950_v1  ;;  %v2724_v31 = vpop.eup %2723  ;;  %v2389_v3 = vadd.f32 %v3960_v12, %v3958_v59 }
 0x1e6   : > { %v2320_v34 = vpop.f32.mrf.mxu0  ;;  %v2726_v6 = vpop.eup %2725 }
 0x1e7   : > { %v3986_v51 = vpop.f32.mrf.mxu1  ;;  %v1112_v5 = vadd.f32 %v3934_v58, %v2319_v23  ;;  %v1652_v37 = vmul.f32 0.6931472, %v2726_v6 }
 0x1e8   : > { %v2321_v16 = vpop.f32.mrf.mxu0 }
 0x1e9   : > { %v3993_v19 = vpop.f32.mrf.mxu1  ;;  %v2322_v58 = vadd.f32 %v2321_v16, %v2320_v34  ;;  %2735 = vlog2.f32 %v1112_v5  ;;  %v1654_v16 = vmul.f32 0.6931472, %v2724_v31 }
 0x1ea   : > { %v2323_v53 = vpop.f32.mrf.mxu0  ;;  %2737 = vlog2.f32 %v1107_v4 }
 0x1eb   : > { %v4002_v21 = vpop.f32.mrf.mxu1  ;;  %v1117_v59 = vadd.f32 %v2322_v58, %v3940_v29  ;;  %v2395_v29 = vadd.f32 %v3968_v44, %v3966_v30 }
 0x1ec   : > { %v2324_v54 = vpop.f32.mrf.mxu0 }
 0x1ed   : > { %v2325_v7 = vadd.f32 %v2324_v54, %v2323_v53  ;;  %v4011_v41 = vpop.f32.mrf.mxu1 }
 0x1ee   : > { %v2470_v45 = vpop.f32.mrf.mxu0 }
 0x1ef   : > { %v1566_v62 = vadd.f32 %v2470_v45, %v2380_v27  ;;  %v4018_v63 = vpop.f32.mrf.mxu1  ;;  %v2728_v27 = vpop.eup %2727  ;;  %v1122_v25 = vadd.f32 %v3938_v35, %v2325_v7  ;;  %v2398_v35 = vadd.f32 %v3974_v2, %v3971_v0  ;;  %v2404_v7 = vadd.f32 %v3986_v51, %v3982_v39 }
 0x1f0   : > { %v1560_v49 = vpop.f32.mrf.mxu0 }
 0x1f1   : > { %v1688_v52 = vsub.f32 %v1672_v13, %v1566_v62  ;;  %v1561_v20 = vadd.f32 %v2377_v28, %v1560_v49  ;;  %v4026_v45 = vpop.f32.mrf.mxu1  ;;  %v2730_v28 = vpop.eup %2729  ;;  %2739 = vlog2.f32 %v1122_v25 }
 0x1f2   : > { %v2473_v11 = vpop.f32.mrf.mxu0  ;;  %2741 = vlog2.f32 %v1117_v59  ;;  %v1656_v31 = vmul.f32 0.6931472, %v2730_v28 }
 0x1f3   : > { %v1801_v1 = vsel %vm3733_vm14, %v1688_v52, 0.0  ;;  %v1687_v48 = vsub.f32 %v1671_v22, %v1561_v20  ;;  %v1576_v36 = vadd.f32 %v2473_v11, %v2386_v8  ;;  %vm4331_vm14 = vmmov %vm4321_vm3  ;;  %v1789_v22 = vld [vmem:[#allocation3 + $0x28] sm:$0xff]  ;;  %v4034_v57 = vpop.f32.mrf.mxu1  ;;  %v1658_v8 = vmul.f32 0.6931472, %v2728_v27  ;;  %v4338_v11 = vld [vmem:[#allocation22_spill] sm:$0xff] }
 0x1f4   : > { %v1817_v50 = vadd.f32 %v1801_v1, %v1785_v38  ;;  %v1570_v24 = vpop.f32.mrf.mxu0  ;;  %v1788_v38 = vld [vmem:[#allocation3 + $0x20] sm:$0xff]  ;;  %v4344_v27 = vld [vmem:[#allocation16_spill] sm:$0xff]  ;;  %v1795_v1 = vld [vmem:[#allocation3 + $0x58] sm:$0xff] }
 0x1f5   : > { %v1800_v53 = vsel %vm3742_vm0, %v1687_v48, 0.0  ;;  %v1690_v61 = vsub.f32 %v1674_v18, %v1576_v36  ;;  %v1571_v54 = vadd.f32 %v2383_v46, %v1570_v24  ;;  %vm4332_vm0 = vmmov %vm4321_vm3  ;;  %v2414_v5 = vpop.f32.mrf.mxu1  ;;  %v1791_v36 = vld [vmem:[#allocation3 + $0x38] sm:$0xff]  ;;  %vm4345_vm15 = vnez %v4344_v27  ;;  %v4363_v27 = vld [vmem:[#allocation31_spill] sm:$0xff] }
 0x1f6   : > { %1833 = vst.msk [vmem:[#allocation3 + $0x8] sm:$0xff] %vm4331_vm14, %v1817_v50  ;;  %v1816_v47 = vadd.f32 %v1800_v53, %v1784_v33  ;;  %v2476_v34 = vpop.f32.mrf.mxu0  ;;  %v4341_v24 = vld [vmem:[#allocation25_spill] sm:$0xff]  ;;  %v2401_v53 = vadd.f32 %v3980_v60, %v3977_v10  ;;  %v4346_v10 = vld [vmem:[#allocation24_spill] sm:$0xff]  ;;  %vm4350_vm10 = vmmov %vm4332_vm0 }
 0x1f7   : > { %v1803_v26 = vsel %vm3753_vm5, %v1690_v61, 0.0  ;;  %v1689_v56 = vsub.f32 %v1673_v42, %v1571_v54  ;;  %v1586_v23 = vadd.f32 %v2476_v34, %v2392_v17  ;;  %vm4334_vm5 = vmmov %vm4332_vm0  ;;  %v4335_v42 = vld [vmem:[#allocation23_spill] sm:$0xff]  ;;  %v2415_v4 = vpop.f32.mrf.mxu1  ;;  %v1680_v6 = vadd.f32 %v1658_v8, %v4341_v24  ;;  %v2732_v17 = vpop.eup %2731 }
 0x1f8   : > { %1832 = vst.msk [vmem:[#allocation3] sm:$0xff] %vm4332_vm0, %v1816_v47  ;;  %v1819_v12 = vadd.f32 %v1803_v26, %v1787_v14  ;;  %v1580_v32 = vpop.f32.mrf.mxu0  ;;  %v1678_v46 = vadd.f32 %v1654_v16, %v4335_v42  ;;  %v1790_v14 = vld [vmem:[#allocation3 + $0x30] sm:$0xff]  ;;  %v2734_v16 = vpop.eup %2733  ;;  %v1679_v60 = vadd.f32 %v1656_v31, %v4346_v10  ;;  %vm4353_vm8 = vmmov %vm4332_vm0  ;;  %v2416_v31 = vadd.f32 %v2415_v4, %v2414_v5 }
 0x1f9   : > { %v1802_v15 = vsel %vm3766_vm9, %v1689_v56, 0.0  ;;  %v1692_v13 = vsub.f32 %v1676_v43, %v1586_v23  ;;  %v1581_v9 = vadd.f32 %v2389_v3, %v1580_v32  ;;  %vm4337_vm9 = vmmov %vm4332_vm0  ;;  %v1677_v43 = vadd.f32 %v1652_v37, %v4338_v11  ;;  %v4055_v3 = vpop.f32.mrf.mxu1  ;;  %v1793_v56 = vld [vmem:[#allocation3 + $0x48] sm:$0xff] }
 0x1fa   : > { %1835 = vst.msk [vmem:[#allocation3 + $0x18] sm:$0xff] %vm4334_vm5, %v1819_v12  ;;  %v1818_v49 = vadd.f32 %v1802_v15, %v1786_v40  ;;  %v2479_v18 = vpop.f32.mrf.mxu0  ;;  %v2736_v12 = vpop.eup %2735  ;;  %v4348_v32 = vld [vmem:[#allocation20_spill] sm:$0xff]  ;;  %vm4354_vm3 = vmmov %vm4332_vm0 }
 0x1fb   : > { %v1805_v2 = vsel %vm3779_vm11, %v1692_v13, 0.0  ;;  %v1691_v52 = vsub.f32 %v4007_v55, %v1581_v9  ;;  %v1596_v20 = vadd.f32 %v2479_v18, %v2398_v35  ;;  %vm4340_vm11 = vmmov %vm4332_vm0  ;;  %v2418_v23 = vpop.f32.mrf.mxu1  ;;  %vm4349_vm6 = vnez %v4348_v32  ;;  %v1792_v35 = vld [vmem:[#allocation3 + $0x40] sm:$0xff]  ;;  %v4351_v9 = vld [vmem:[#allocation21_spill] sm:$0xff] }
 0x1fc   : > { %1834 = vst.msk [vmem:[#allocation3 + $0x10] sm:$0xff] %vm4337_vm9, %v1818_v49  ;;  %v1821_v30 = vadd.f32 %v1805_v2, %v1789_v22  ;;  %v1590_v44 = vpop.f32.mrf.mxu0  ;;  %v1662_v13 = vmul.f32 0.6931472, %v2734_v16  ;;  %v2738_v22 = vpop.eup %2737  ;;  %vm4352_vm1 = vnez %v4351_v9  ;;  %v2410_v18 = vadd.f32 %v4018_v63, %v4011_v41  ;;  %v4356_v63 = vld [vmem:[#allocation26_spill] sm:$0xff]  ;;  %v4360_v4 = vld [vmem:[#allocation28_spill] sm:$0xff]  ;;  %vm4366_vm9 = vmmov %vm4332_vm0 }
 0x1fd   : > { %v1804_v48 = vsel %vm3791_vm2, %v1691_v52, 0.0  ;;  %v1694_v33 = vsub.f32 %v1678_v46, %v1596_v20  ;;  %v1591_v55 = vadd.f32 %v2395_v29, %v1590_v44  ;;  %vm4343_vm2 = vmmov %vm4332_vm0  ;;  %v2420_v62 = vpop.f32.mrf.mxu1  ;;  %v1660_v46 = vmul.f32 0.6931472, %v2732_v17  ;;  %v4355_v20 = vld [vmem:[#allocation27_spill] sm:$0xff] }
 0x1fe   : > { %1837 = vst.msk [vmem:[#allocation3 + $0x28] sm:$0xff] %vm4340_vm11, %v1821_v30  ;;  %v1820_v58 = vadd.f32 %v1804_v48, %v1788_v38  ;;  %v2482_v50 = vpop.f32.mrf.mxu0  ;;  %v1666_v0 = vmul.f32 0.6931472, %v2736_v12  ;;  %v2740_v2 = vpop.eup %2739  ;;  %v2407_v52 = vadd.f32 %v4002_v21, %v3993_v19  ;;  %v1682_v30 = vadd.f32 %v1662_v13, %v4355_v20  ;;  %v4358_v21 = vld [vmem:[#allocation18_spill] sm:$0xff] }
 0x1ff   : > { %v1807_v39 = vsel %vm3804_vm7, %v1694_v33, 0.0  ;;  %v1693_v51 = vsub.f32 %v1677_v43, %v1591_v55  ;;  %v1606_v54 = vadd.f32 %v2482_v50, %v2404_v7  ;;  %vm4347_vm7 = vmmov %vm4332_vm0  ;;  %v2421_v49 = vpop.f32.mrf.mxu1  ;;  %v2742_v44 = vpop.eup %2741  ;;  %v1664_v43 = vmul.f32 0.6931472, %v2738_v22  ;;  %v4369_v13 = vld [vmem:[#allocation30_spill] sm:$0xff] }
 0x200   : > { %1836 = vst.msk [vmem:[#allocation3 + $0x20] sm:$0xff] %vm4343_vm2, %v1820_v58  ;;  %v1823_v47 = vadd.f32 %v1807_v39, %v1791_v36  ;;  %v1600_v34 = vpop.f32.mrf.mxu0  ;;  %v1681_v48 = vadd.f32 %v1660_v46, %v4356_v63  ;;  %v4357_v36 = vld [vmem:[#allocation29_spill] sm:$0xff]  ;;  %v1670_v58 = vmul.f32 0.6931472, %v2740_v2  ;;  %v2413_v19 = vadd.f32 %v4034_v57, %v4026_v45  ;;  %vm4370_vm2 = vmmov %vm4332_vm0 }
 0x201   : > { %v1806_v25 = vsel %vm4345_vm15, %v1693_v51, 0.0  ;;  %v1696_v26 = vsub.f32 %v1680_v6, %v1606_v54  ;;  %v1601_v40 = vadd.f32 %v2401_v53, %v1600_v34  ;;  %v2485_v8 = vpop.f32.mrf.mxu1  ;;  %v1684_v55 = vadd.f32 %v1666_v0, %v4357_v36  ;;  %v1794_v6 = vld [vmem:[#allocation3 + $0x50] sm:$0xff]  ;;  %v1797_v34 = vld [vmem:[#allocation3 + $0x68] sm:$0xff]  ;;  %vm4372_vm15 = vmmov %vm4332_vm0 }
 0x202   : > { %1839 = vst.msk [vmem:[#allocation3 + $0x38] sm:$0xff] %vm4347_vm7, %v1823_v47  ;;  %v1822_v59 = vadd.f32 %v1806_v25, %v1790_v14  ;;  %v1616_v38 = vadd.f32 %v2485_v8, %v2410_v18  ;;  %vm4359_vm4 = vnez %v4358_v21  ;;  %v1683_v61 = vadd.f32 %v1664_v43, %v4360_v4  ;;  %v4361_v14 = vld [vmem:[#allocation19_spill] sm:$0xff]  ;;  %vm4374_vm7 = vmmov %vm4332_vm0 }
 0x203   : > { %v1809_v37 = vsel %vm4349_vm6, %v1696_v26, 0.0  ;;  %v1695_v28 = vsub.f32 %v1679_v60, %v1601_v40  ;;  %v1610_v11 = vpop.f32.mrf.mxu1  ;;  %v1668_v39 = vmul.f32 0.6931472, %v2742_v44  ;;  %v2422_v51 = vadd.f32 %v2421_v49, %v2420_v62  ;;  %v1796_v60 = vld [vmem:[#allocation3 + $0x60] sm:$0xff]  ;;  %v1799_v62 = vld [vmem:[#allocation3 + $0x78] sm:$0xff]  ;;  %v1798_v49 = vld [vmem:[#allocation3 + $0x70] sm:$0xff] }
 0x204   : > { %1838 = vst.msk [vmem:[#allocation3 + $0x30] sm:$0xff] %vm4350_vm10, %v1822_v59  ;;  %v1825_v15 = vadd.f32 %v1809_v37, %v1793_v56  ;;  %v1698_v7 = vsub.f32 %v1682_v30, %v1616_v38  ;;  %v1611_v41 = vadd.f32 %v2407_v52, %v1610_v11  ;;  %vm4362_vm14 = vnez %v4361_v14  ;;  %v4364_v56 = vld [vmem:[#allocation14_spill] sm:$0xff]  ;;  %v4367_v37 = vld [vmem:[#allocation32_spill] sm:$0xff]  ;;  %vm4375_vm6 = vmmov %vm4332_vm0 }
 0x205   : > { %v1808_v29 = vsel %vm4352_vm1, %v1695_v28, 0.0  ;;  %v2488_v33 = vpop.f32.mrf.mxu1  ;;  %v1686_v25 = vadd.f32 %v1670_v58, %v4363_v27  ;;  %v2419_v26 = vadd.f32 %v2418_v23, %v4055_v3  ;;  %vm4365_vm5 = vnez %v4364_v56 }
 0x206   : > { %1841 = vst.msk [vmem:[#allocation3 + $0x48] sm:$0xff] %vm4353_vm8, %v1825_v15  ;;  %v1824_v42 = vadd.f32 %v1808_v29, %v1792_v35  ;;  %v1811_v50 = vsel %vm4359_vm4, %v1698_v7, 0.0  ;;  %v1697_v24 = vsub.f32 %v1681_v48, %v1611_v41  ;;  %v1626_v17 = vadd.f32 %v2488_v33, %v2416_v31 }
 0x207   : > { %v1827_v53 = vadd.f32 %v1811_v50, %v1795_v1  ;;  %v1620_v5 = vpop.f32.mrf.mxu1  ;;  %vm4368_vm11 = vnez %v4367_v37  ;;  %v1685_v22 = vadd.f32 %v1668_v39, %v4369_v13 }
 0x208   : > { %1840 = vst.msk [vmem:[#allocation3 + $0x40] sm:$0xff] %vm4354_vm3, %v1824_v42  ;;  %v1810_v54 = vsel %vm4362_vm14, %v1697_v24, 0.0  ;;  %v1700_v47 = vsub.f32 %v1684_v55, %v1626_v17  ;;  %v1621_v16 = vadd.f32 %v2413_v19, %v1620_v5 }
 0x209   : > { %1843 = vst.msk [vmem:[#allocation3 + $0x58] sm:$0xff] %vm4332_vm0, %v1827_v53  ;;  %v1826_v45 = vadd.f32 %v1810_v54, %v1794_v6  ;;  %v2491_v57 = vpop.f32.mrf.mxu1 }
 0x20a   : > { %v1813_v40 = vsel %vm4365_vm5, %v1700_v47, 0.0  ;;  %v1699_v10 = vsub.f32 %v1683_v61, %v1621_v16  ;;  %v1636_v59 = vadd.f32 %v2491_v57, %v2422_v51 }
 0x20b   : > { %1842 = vst.msk [vmem:[#allocation3 + $0x50] sm:$0xff] %vm4366_vm9, %v1826_v45  ;;  %v1829_v12 = vadd.f32 %v1813_v40, %v1797_v34  ;;  %v1630_v32 = vpop.f32.mrf.mxu1 }
 0x20c   : > { %v1812_v28 = vsel %vm4368_vm11, %v1699_v10, 0.0  ;;  %v1702_v35 = vsub.f32 %v1686_v25, %v1636_v59  ;;  %v1631_v15 = vadd.f32 %v2419_v26, %v1630_v32 }
 0x20d   : > { %1845 = vst.msk [vmem:[#allocation3 + $0x68] sm:$0xff] %vm4370_vm2, %v1829_v12  ;;  %v1828_v3 = vadd.f32 %v1812_v28, %v1796_v60 }
 0x20e   : > { %v1815_v9 = vsel %vm3905_vm13, %v1702_v35, 0.0  ;;  %v1701_v29 = vsub.f32 %v1685_v22, %v1631_v15 }
 0x20f   : > { %1844 = vst.msk [vmem:[#allocation3 + $0x60] sm:$0xff] %vm4372_vm15, %v1828_v3  ;;  %v1831_v18 = vadd.f32 %v1815_v9, %v1799_v62  ;;  %1915 = sbr.rel (%p2242_p1) target bundleno = 776 (0x308), region = 40 }
 0x210   : > { %v1814_v46 = vsel %vm3913_vm12, %v1701_v29, 0.0 }
 0x211   : > { %1847 = vst.msk [vmem:[#allocation3 + $0x78] sm:$0xff] %vm4374_vm7, %v1831_v18  ;;  %v1830_v8 = vadd.f32 %v1814_v46, %v1798_v49 }
 0x213   : > { %1846 = vst.msk [vmem:[#allocation3 + $0x70] sm:$0xff] %vm4375_vm6, %v1830_v8 }
 0x214   : > { %v1916_v0 = vld [vmem:[#allocation2] sm:$0x1]  ;;  %v1983_v2 = vld [vmem:[#allocation4] sm:$0xff]  ;;  %v1984_v52 = vld [vmem:[#allocation4 + $0x8] sm:$0xff]  ;;  %vm4376_vm13 = vcmask 1040384   ;;  %vm4377_vm10 = vcmask 7168  }
 0x215   : > { %v1917_v38 = vsel %vm4376_vm13, %v1916_v0, 0.0  ;;  %v1985_v20 = vld [vmem:[#allocation4 + $0x10] sm:$0xff]  ;;  %v1986_v30 = vld [vmem:[#allocation4 + $0x18] sm:$0xff]  ;;  %v1999_v44 = vsel %vm4377_vm10, %v1983_v2, 0.0  ;;  %vm4378_vm1 = vmmov %vm4377_vm10 }
 0x216   : > { %v2000_v11 = vsel %vm4378_vm1, %v1984_v52, 0.0  ;;  %1918 = vadd.xlane.f32.xlu0 %v1917_v38  ;;  %v1987_v43 = vld [vmem:[#allocation4 + $0x20] sm:$0xff]  ;;  %vm4379_vm12 = vmmov %vm4378_vm1  ;;  %v1988_v41 = vld [vmem:[#allocation4 + $0x28] sm:$0xff] }
 0x217   : > { %v2001_v31 = vadd.f32 %v2000_v11, %v1999_v44  ;;  %v2002_v7 = vsel %vm4379_vm12, %v1985_v20, 0.0  ;;  %vm4380_vm8 = vmmov %vm4378_vm1  ;;  %v1989_v48 = vld [vmem:[#allocation4 + $0x30] sm:$0xff]  ;;  %v1927_v36 = vld [vmem:[#allocation3] sm:$0xff] }
 0x218   : > { %v2004_v1 = vsel %vm4380_vm8, %v1986_v30, 0.0  ;;  %vm4381_vm3 = vmmov %vm4378_vm1  ;;  %v1928_v58 = vld [vmem:[#allocation3 + $0x8] sm:$0xff]  ;;  %v1929_v19 = vld [vmem:[#allocation3 + $0x10] sm:$0xff] }
 0x219   : > { %v2003_v63 = vadd.f32 %v2002_v7, %v2001_v31  ;;  %v2006_v33 = vsel %vm4381_vm3, %v1987_v43, 0.0  ;;  %v1930_v21 = vld [vmem:[#allocation3 + $0x18] sm:$0xff]  ;;  %vm4382_vm4 = vmmov %vm4378_vm1  ;;  %v1931_v4 = vld [vmem:[#allocation3 + $0x20] sm:$0xff] }
 0x21a   : > { %v1943_v50 = vsel %vm4382_vm4, %v1927_v36, 0.0  ;;  %vm4383_vm14 = vmmov %vm4378_vm1  ;;  %v1990_v53 = vld [vmem:[#allocation4 + $0x38] sm:$0xff]  ;;  %v1991_v14 = vld [vmem:[#allocation4 + $0x40] sm:$0xff] }
 0x21b   : > { %v2005_v55 = vadd.f32 %v2004_v1, %v2003_v63  ;;  %v2008_v24 = vsel %vm4383_vm14, %v1988_v41, 0.0  ;;  %vm4384_vm0 = vmmov %vm4378_vm1  ;;  %v1932_v47 = vld [vmem:[#allocation3 + $0x28] sm:$0xff]  ;;  %v1933_v25 = vld [vmem:[#allocation3 + $0x30] sm:$0xff] }
 0x21c   : > { %v1944_v6 = vsel %vm4384_vm0, %v1928_v58, 0.0  ;;  %vm4385_vm5 = vmmov %vm4384_vm0  ;;  %v1992_v57 = vld [vmem:[#allocation4 + $0x48] sm:$0xff]  ;;  %v1993_v10 = vld [vmem:[#allocation4 + $0x50] sm:$0xff] }
 0x21d   : > { %v1946_v17 = vsel %vm4385_vm5, %v1929_v19, 0.0  ;;  %v2007_v5 = vadd.f32 %v2006_v33, %v2005_v55  ;;  %v1945_v61 = vadd.f32 %v1944_v6, %v1943_v50  ;;  %vm4386_vm9 = vmmov %vm4384_vm0  ;;  %v1934_v59 = vld [vmem:[#allocation3 + $0x38] sm:$0xff]  ;;  %v1935_v62 = vld [vmem:[#allocation3 + $0x40] sm:$0xff] }
 0x21e   : > { %v2010_v39 = vsel %vm4386_vm9, %v1989_v48, 0.0  ;;  %vm4387_vm11 = vmmov %vm4384_vm0  ;;  %v1994_v28 = vld [vmem:[#allocation4 + $0x58] sm:$0xff]  ;;  %v1995_v3 = vld [vmem:[#allocation4 + $0x60] sm:$0xff] }
 0x21f   : > { %v1948_v51 = vsel %vm4387_vm11, %v1930_v21, 0.0  ;;  %v2009_v54 = vadd.f32 %v2008_v24, %v2007_v5  ;;  %v1947_v34 = vadd.f32 %v1946_v17, %v1945_v61  ;;  %vm4388_vm2 = vmmov %vm4384_vm0  ;;  %v1936_v9 = vld [vmem:[#allocation3 + $0x48] sm:$0xff]  ;;  %v1937_v8 = vld [vmem:[#allocation3 + $0x50] sm:$0xff] }
 0x220   : > { %v2012_v16 = vsel %vm4388_vm2, %v1990_v53, 0.0  ;;  %vm4389_vm15 = vmmov %vm4384_vm0  ;;  %v1996_v42 = vld [vmem:[#allocation4 + $0x68] sm:$0xff]  ;;  %v1997_v38 = vld [vmem:[#allocation4 + $0x70] sm:$0xff] }
 0x221   : > { %v1950_v45 = vsel %vm4389_vm15, %v1931_v4, 0.0  ;;  %v2011_v27 = vadd.f32 %v2010_v39, %v2009_v54  ;;  %v1949_v26 = vadd.f32 %v1948_v51, %v1947_v34  ;;  %vm4390_vm7 = vmmov %vm4384_vm0  ;;  %v1938_v30 = vld [vmem:[#allocation3 + $0x58] sm:$0xff]  ;;  %v2024_v11 = vsel %vm4384_vm0, %v1996_v42, 0.0  ;;  %v1939_v1 = vld [vmem:[#allocation3 + $0x60] sm:$0xff] }
 0x222   : > { %v2014_v56 = vsel %vm4390_vm7, %v1991_v14, 0.0  ;;  %vm4391_vm6 = vmmov %vm4384_vm0  ;;  %v1998_v31 = vld [vmem:[#allocation4 + $0x78] sm:$0xff]  ;;  %v1940_v36 = vld [vmem:[#allocation3 + $0x68] sm:$0xff] }
 0x223   : > { %v1952_v40 = vsel %vm4391_vm6, %v1932_v47, 0.0  ;;  %v2013_v60 = vadd.f32 %v2012_v16, %v2011_v27  ;;  %v1951_v12 = vadd.f32 %v1950_v45, %v1949_v26  ;;  %vm4392_vm13 = vmmov %vm4384_vm0  ;;  %v1941_v50 = vld [vmem:[#allocation3 + $0x70] sm:$0xff]  ;;  %v1942_v53 = vld [vmem:[#allocation3 + $0x78] sm:$0xff] }
 0x224   : > { %v2016_v32 = vsel %vm4392_vm13, %v1992_v57, 0.0  ;;  %vm4393_vm10 = vmmov %vm4384_vm0 }
 0x225   : > { %v1954_v37 = vsel %vm4393_vm10, %v1933_v25, 0.0  ;;  %v2015_v35 = vadd.f32 %v2014_v56, %v2013_v60  ;;  %v1953_v15 = vadd.f32 %v1952_v40, %v1951_v12  ;;  %vm4394_vm1 = vmmov %vm4384_vm0 }
 0x226   : > { %v2018_v13 = vsel %vm4394_vm1, %v1993_v10, 0.0  ;;  %vm4395_vm12 = vmmov %vm4384_vm0 }
 0x227   : > { %v1956_v22 = vsel %vm4395_vm12, %v1934_v59, 0.0  ;;  %v2017_v23 = vadd.f32 %v2016_v32, %v2015_v35  ;;  %v1955_v29 = vadd.f32 %v1954_v37, %v1953_v15  ;;  %vm4396_vm8 = vmmov %vm4384_vm0  ;;  %vm2046_vm12 = vcmask 16384  }
 0x228   : > { %v2020_v49 = vsel %vm4396_vm8, %v1994_v28, 0.0  ;;  %vm4397_vm3 = vmmov %vm4384_vm0 }
 0x229   : > { %v1958_v18 = vsel %vm4397_vm3, %v1935_v62, 0.0  ;;  %v2019_v46 = vadd.f32 %v2018_v13, %v2017_v23  ;;  %v1957_v0 = vadd.f32 %v1956_v22, %v1955_v29  ;;  %vm4398_vm4 = vmmov %vm4384_vm0  ;;  %v4408_v13 = vld [vmem:[#allocation12_spill] sm:$0xff] }
 0x22a   : > { %v2022_v2 = vsel %vm4398_vm4, %v1995_v3, 0.0  ;;  %vm4399_vm14 = vmmov %vm4384_vm0  ;;  %vm2040_vm10 = vcmp.eq.s32.totalorder %v4408_v13, 1  ;;  %vm2039_vm1 = vcmp.eq.s32.totalorder %v4408_v13, 0 }
 0x22b   : > { %v1960_v52 = vsel %vm4399_vm14, %v1936_v9, 0.0  ;;  %v2021_v20 = vadd.f32 %v2020_v49, %v2019_v46  ;;  %v1959_v44 = vadd.f32 %v1958_v18, %v1957_v0  ;;  %vm4400_vm5 = vmmov %vm4384_vm0 }
 0x22c   : > { %v1962_v43 = vsel %vm4400_vm5, %v1937_v8, 0.0  ;;  %vm4401_vm9 = vmmov %vm4384_vm0 }
 0x22d   : > { %v2023_v7 = vadd.f32 %v2022_v2, %v2021_v20  ;;  %v1961_v41 = vadd.f32 %v1960_v52, %v1959_v44  ;;  %v2026_v63 = vsel %vm4401_vm9, %v1997_v38, 0.0  ;;  %vm4402_vm11 = vmmov %vm4384_vm0 }
 0x22e   : > { %v1964_v48 = vsel %vm4402_vm11, %v1938_v30, 0.0  ;;  %vm4403_vm2 = vmmov %vm4384_vm0 }
 0x22f   : > { %v2025_v33 = vadd.f32 %v2024_v11, %v2023_v7  ;;  %v1963_v55 = vadd.f32 %v1962_v43, %v1961_v41  ;;  %v2028_v58 = vsel %vm4403_vm2, %v1998_v31, 0.0  ;;  %vm4404_vm15 = vmmov %vm4384_vm0 }
 0x230   : > { %v1966_v19 = vsel %vm4404_vm15, %v1939_v1, 0.0  ;;  %vm4405_vm7 = vmmov %vm4384_vm0 }
 0x231   : > { %v2027_v21 = vadd.f32 %v2026_v63, %v2025_v33  ;;  %v1965_v24 = vadd.f32 %v1964_v48, %v1963_v55  ;;  %v1968_v6 = vsel %vm4405_vm7, %v1940_v36, 0.0  ;;  %vm4406_vm6 = vmmov %vm4384_vm0 }
 0x232   : > { %v1970_v4 = vsel %vm4406_vm6, %v1941_v50, 0.0  ;;  %vm4407_vm13 = vmmov %vm4384_vm0 }
 0x233   : > { %v2029_v17 = vadd.f32 %v2028_v58, %v2027_v21  ;;  %v1967_v5 = vadd.f32 %v1966_v19, %v1965_v24  ;;  %v1972_v39 = vsel %vm4407_vm13, %v1942_v53, 0.0 }
 0x235   : > { %2030 = vadd.xlane.f32.xlu1 %v2029_v17  ;;  %v1969_v61 = vadd.f32 %v1968_v6, %v1967_v5 }
 0x237   : > { %v1971_v51 = vadd.f32 %v1970_v4, %v1969_v61 }
 0x239   : > { %v1973_v14 = vadd.f32 %v1972_v39, %v1971_v51 }
 0x23b   : > { %1974 = vadd.xlane.f32.xlu0 %v1973_v14 }
 0x29f   : > { %v1919_v54 = vpop.xlane.xlu0 %1918 }
 0x2a0   : > { %v1920_v47 = vrot.slane %v1919_v54, 4 }
 0x2a2   : > { %v1921_v34 = vadd.f32 %v1920_v47, %v1919_v54 }
 0x2a4   : > { %v1922_v16 = vrot.slane %v1921_v34, 2 }
 0x2a6   : > { %v1923_v45 = vadd.f32 %v1922_v16, %v1921_v34 }
 0x2a8   : > { %v1924_v57 = vrot.slane %v1923_v45, 1 }
 0x2aa   : > { %v1925_v27 = vadd.f32 %v1924_v57, %v1923_v45 }
 0x2ac   : > { %2527 = vpush %v1925_v27 }
 0x2be   : > { %v2031_v25 = vpop.xlane.xlu1 %2030 }
 0x2bf   : > { %v2032_v26 = vrot.slane %v2031_v25, 4 }
 0x2c1   : > { %v2033_v56 = vadd.f32 %v2032_v26, %v2031_v25 }
 0x2c3   : > { %v2034_v40 = vrot.slane %v2033_v56, 2 }
 0x2c4   : > { %v1975_v10 = vpop.xlane.xlu0 %1974 }
 0x2c5   : > { %v1976_v60 = vrot.slane %v1975_v10, 4  ;;  %v2035_v59 = vadd.f32 %v2034_v40, %v2033_v56 }
 0x2c7   : > { %v1977_v12 = vadd.f32 %v1976_v60, %v1975_v10  ;;  %v2036_v37 = vrot.slane %v2035_v59, 1 }
 0x2c9   : > { %v1978_v32 = vrot.slane %v1977_v12, 2  ;;  %v2037_v62 = vadd.f32 %v2036_v37, %v2035_v59 }
 0x2cb   : > { %v1979_v28 = vadd.f32 %v1978_v32, %v1977_v12 }
 0x2cd   : > { %v1980_v35 = vrot.slane %v1979_v28, 1 }
 0x2cf   : > { %v1981_v15 = vadd.f32 %v1980_v35, %v1979_v28 }
 0x2d1   : > { %2529 = vpush %v1981_v15 }
 0x2d2   : > { %2531 = vpush %v2037_v62 }
 0x2dd   : > { %s2528_s15 = spop %2527 }
 0x2de   : > { %v2044_v23 = vstv %s2528_s15 }
 0x302   : > { %s2530_s23 = spop %2529 }
 0x303   : > { %v2041_v22 = vstv %s2530_s23  ;;  %s2532_s29 = spop %2531 }
 0x304   : > { %v2042_v3 = vstv %s2532_s29 }
 0x305   : > { %v2043_v9 = vsel %vm2040_vm10, %v2041_v22, %v2042_v3 }
 0x306   : > { %v2045_v29 = vsel %vm2039_vm1, %v2044_v23, %v2043_v9 }
 0x307   : > { %2047 = vst.msk [vmem:[%s3007_s18] sm:$0x1] %vm2046_vm12, %v2045_v29 }
 0x308 PF: > { %s2243_s4 = sshll.u32 %s2874_s16, 4  ;;  %s2061_s8 = sshll.u32 %s3007_s18, 4  ;;  %s2062_s8 = int_to_ptr.vmem [resolvable:$true] %s2061_s8 }
 0x309   : > { %s2059_s7 = scalar_lea.hbm %s4187_s3, %s2243_s4  ;;  %s4409_s9 = sand.u32 1, %s2862_s13  }
 0x30a   : > { %s2049_s10 = scalar_lea.sflag [#allocation6], %s4409_s9  ;;  %s2794_s11 = scalar_lea.vmem %s2062_s8, 16 }
 0x30b   : > { %p2795_p2 = scmp.ne.s32.totalorder %s2062_s8, %s2794_s11  ;;  %s2893_s20 = smov [#allocation5]  }
 0x30c   : > { %s2798_s21 = sshll.u32 %s2893_s20, 4  ;;  %s2799_s21 = int_to_ptr.vmem [resolvable:$false] %s2798_s21 }
 0x30d   : > { %p2796_p4 = pnand %p2795_p2, %p2963_p3  ;;  %s2800_s26 = scalar_lea.vmem %s2799_s21, 32 }
 0x30e   : > { %p2801_p6 = scmp.lt.s32.totalorder %s2062_s8, %s2799_s21  ;;  %p2802_p7 = scmp.lt.s32.totalorder %s2800_s26, %s2794_s11 }
 0x30f   : > { %p2797_p5 = pneg %p2796_p4 }
 0x310   : > { %p2803_p8 = por %p2802_p7, %p2801_p6 }
 0x312   : > { %p2804_p10 = pnand %p2803_p8, %p2797_p5 }
 0x314   : > { %2807 = shalt.err (!%p2804_p10)
}
 0x315   : > { %s2808_s16 = scalar_lea.hbm %s2059_s7, 16  ;;  %s2812_s30 = scalar_lea.hbm %s4187_s3, 32 }
 0x316   : > { %p2809_p11 = scmp.ne.s32.totalorder %s2059_s7, %s2808_s16  ;;  %p2813_p0 = scmp.lt.s32.totalorder %s2059_s7, %s4187_s3 }
 0x317   : > { %p2814_p1 = scmp.lt.s32.totalorder %s2812_s30, %s2808_s16 }
 0x318   : > { %p2810_p12 = pnand %p2809_p11, %p2963_p3 }
 0x319   : > { %p2815_p2 = por %p2814_p1, %p2813_p0 }
 0x31a   : > { %p2811_p13 = pneg %p2810_p12 }
 0x31c   : > { %p2816_p4 = pnand %p2815_p2, %p2811_p13 }
 0x31e   : > { %2819 = shalt.err (!%p2816_p4)
}
 0x31f   : > { %2533 = dma.vmem_to_hbm [thread:$0]  (%p2963_p3), %s2062_s8, 16, %s2059_s7, %s2049_s10  }
 0x320 PF: > { %p2539_p5 = scmp.ge.s32.totalorder %s2886_s19, 2  ;;  %s2073_s23 = sand.u32 1, %s2858_s12  }
 0x321   : > { %s2074_s29 = scalar_lea.sflag [#allocation6], %s2073_s23 }
 0x322   : > { %p2536_p6 = pnand %p2539_p5, %p2973_p9 }
 0x324   : > { %p2537_p7 = pneg %p2536_p6 }
 0x326   : > { %2853 = dma.done.wait (%p2537_p7), %s2074_s29, 16  }
 0x327   : > { %2855 = vsyncadd (%p2537_p7), %s2074_s29, 4294967280  ;;  %s16_s19 = sadd.s32 1, %s2886_s19   ;;  %s4410_s16 = sld [smem:[#allocation8_spill]] }
 0x328   : > { %p13_p8 = scmp.ge.s32.totalorder %s16_s19, 6   ;;  %s4411_s24 = sld [smem:[#allocation9_spill]] }
 0x329   : > { %s4412_s18 = sld [smem:[#allocation10_spill]]  ;;  %s4413_s12 = smov %s2862_s13 }
 0x32a   : > { %s4414_s13 = smov %s2866_s14  ;;  %s4415_s14 = smov %s2981_s28 }
 0x32b   : > { %s4416_s15 = smov %s2878_s17  ;;  %15 = sbr.rel (!%p13_p8) target bundleno = 5 (0x5), region = 81 }
 0x32e   : > { %s4417_s17 = smov %s4411_s24 }
 0x330   :  { %2078 = vsyncpa [#allocation6], 1 }
 0x331   :  { %2080 = vsyncpa [#allocation6 + $0x1], 1 }

</bundles_post_ra>
